<compile_context>
chip_gen: v7x
topology: tpu7x:2x2x1
jax: 0.10.0
libtpu: 0.0.40
codegen_flags: <defaults>
</compile_context>

<pallas_src>
import numpy as np
import jax
import jax.numpy as jnp
from jax.experimental import pallas as pl
from jax.experimental.pallas import tpu as pltpu

NEG_SLOPE = 0.01   # nn.LeakyReLU default negative_slope
JP = 64            # joint dim padded to a sublane/lane friendly 64
K1 = 128           # lane-aligned fused first-layer contraction dim: [z | shape]


def _leaky(h):
    return jnp.where(h >= 0, h, NEG_SLOPE * h)


# ----------------------------------------------------------------------------
# Pallas kernel: one grid step == one coupling stage (weights streamed per
# stage, z / log_det carried in VMEM scratch).
# ----------------------------------------------------------------------------
def _stage_kernel(
    state0_ref, cmask_ref, mjm_ref,
    W1f_ref, b1f_ref,
    sW2_ref, sb2_ref, sW3_ref, sb3_ref,
    tW2_ref, tb2_ref, tW3_ref, tb3_ref,
    state_out_ref, ld_out_ref,
    state_sc, ld_sc,
):
    step = pl.program_id(0)
    n_stages = pl.num_programs(0)
    H = sW2_ref.shape[-1]

    @pl.when(step == 0)
    def _():
        state_sc[...] = state0_ref[...]          # (B, 128) = [z_pad | shape_pad]
        ld_sc[...] = jnp.zeros_like(ld_sc)

    st = state_sc[...]                           # (B, 128) f32
    # Layer-1 input [z*jm_i | shape*sm_i] via a single combined-mask multiply.
    inp = (st * cmask_ref[...]).astype(jnp.bfloat16)          # (B, 128) bf16

    # Fused s/t first layer: one K=128 matmul, columns [0:H)=s-net, [H:2H)=t-net.
    h = jnp.dot(inp, W1f_ref[...], preferred_element_type=jnp.float32) + b1f_ref[...]
    h = _leaky(h)                                # (B, 2H) f32
    hs = h[:, :H]                                # lane-aligned split at 512
    ht = h[:, H:]

    def tail(hx, W2_ref, b2_ref, W3_ref, b3_ref, use_tanh):
        hx = _leaky(jnp.dot(hx.astype(jnp.bfloat16), W2_ref[...],
                            preferred_element_type=jnp.float32) + b2_ref[...])
        o = jnp.dot(hx.astype(jnp.bfloat16), W3_ref[...],
                    preferred_element_type=jnp.float32) + b3_ref[...]
        return jnp.tanh(o) if use_tanh else o

    m = mjm_ref[...]                             # (1, JP), pad lanes exactly 0
    one_m = 1.0 - m
    s = tail(hs, sW2_ref, sb2_ref, sW3_ref, sb3_ref, True) * one_m   # (B, JP)
    t = tail(ht, tW2_ref, tb2_ref, tW3_ref, tb3_ref, False) * one_m  # (B, JP)

    z = state_sc[:, :JP]                         # (B, JP); pad lanes stay 0
    # z <- (1 - m) * (z - t) * exp(-s) + m * z ; log_det_J -= s.sum(dim=1)
    z_new = one_m * (z - t) * jnp.exp(-s) + z * m
    state_sc[:, :JP] = z_new
    ld_sc[...] = ld_sc[...] - jnp.sum(s, axis=1, keepdims=True)

    @pl.when(step == n_stages - 1)
    def _():
        state_out_ref[...] = state_sc[...]       # lane-dense (B, 128) store
        ld_out_ref[...] = ld_sc[...]


# ----------------------------------------------------------------------------
# Wrapper
# ----------------------------------------------------------------------------
def shape_cond_realnvp_forward_p(x, shape, packed):
    """forward_p(x, shape) -> (z, None, log_det_J)."""
    B, J = x.shape
    S = shape.shape[1]
    N = packed["cmask"].shape[0]
    H = packed["sW2"].shape[-1]
    assert J <= JP and S <= K1 - JP

    # Lane-dense initial state slab [z | shape], pad lanes exactly zero.
    state0 = jnp.zeros((B, K1), jnp.float32)
    state0 = state0.at[:, :J].set(x.astype(jnp.float32))
    state0 = state0.at[:, JP:JP + S].set(shape.astype(jnp.float32))

    stage_spec = lambda blk: pl.BlockSpec(blk, lambda i: (i, 0, 0))
    const_spec = lambda blk: pl.BlockSpec(blk, lambda i: (0, 0))

    grid_spec = pltpu.PrefetchScalarGridSpec(
        num_scalar_prefetch=0,
        grid=(N,),
        in_specs=[
            const_spec((B, K1)),                 # state0
            stage_spec((None, 1, K1)),           # cmask  (N,1,128)
            stage_spec((None, 1, JP)),           # mjm    (N,1,64)
            stage_spec((None, K1, 2 * H)),       # W1f    (N,128,2H) bf16
            stage_spec((None, 1, 2 * H)),        # b1f
            stage_spec((None, H, H)),            # sW2
            stage_spec((None, 1, H)),            # sb2
            stage_spec((None, H, JP)),           # sW3
            stage_spec((None, 1, JP)),           # sb3
            stage_spec((None, H, H)),            # tW2
            stage_spec((None, 1, H)),            # tb2
            stage_spec((None, H, JP)),           # tW3
            stage_spec((None, 1, JP)),           # tb3
        ],
        out_specs=[
            const_spec((B, K1)),                 # final state slab
            const_spec((B, 1)),                  # log_det
        ],
        scratch_shapes=[
            pltpu.VMEM((B, K1), jnp.float32),    # carried [z | shape] state
            pltpu.VMEM((B, 1), jnp.float32),     # carried log_det
        ],
    )

    state_out, ld = pl.pallas_call(
        _stage_kernel,
        grid_spec=grid_spec,
        out_shape=[jax.ShapeDtypeStruct((B, K1), jnp.float32),
                   jax.ShapeDtypeStruct((B, 1), jnp.float32)],
        compiler_params=pltpu.CompilerParams(
            dimension_semantics=("arbitrary",)),
    )(state0, packed["cmask"], packed["mjm"],
      packed["W1f"], packed["b1f"],
      packed["sW2"], packed["sb2"], packed["sW3"], packed["sb3"],
      packed["tW2"], packed["tb2"], packed["tW3"], packed["tb3"])

    return state_out[:, :J], None, ld[:, 0]


# ----------------------------------------------------------------------------
# Deterministic "raw" parameter construction (shapes from the module __init__)
# ----------------------------------------------------------------------------
def init_params(key, jts_tot_dim, shape_tot_dim, num_stack, hidden_dim=512):
    J, S, N, H = jts_tot_dim, shape_tot_dim, num_stack, hidden_dim

    jm = jnp.asarray(np.array([[0, 1] * (J // 2), [1, 0] * (J // 2)] * (N // 2),
                              dtype=np.float32))                     # (N, J)
    # NOTE: set to ones so the shape-conditioning path is actually exercised
    # by the test (an all-zero mask would leave it untested).  The real
    # module's shape mask should be substituted here by the caller.
    sm = jnp.ones((N,), jnp.float32)                                  # (N,)

    def make_net(k):
        ks = jax.random.split(k, 7)
        sc = 0.05
        return {
            # W1 ~ nn.Linear(J + S, H) applied as cat(jts, shape) @ W1
            "W1": sc * jax.random.normal(ks[0], (N, J + S, H), jnp.float32),
            "b1": sc * jax.random.normal(ks[2], (N, 1, H), jnp.float32),
            "W2": sc * jax.random.normal(ks[3], (N, H, H), jnp.float32),
            "b2": sc * jax.random.normal(ks[4], (N, 1, H), jnp.float32),
            "W3": sc * jax.random.normal(ks[5], (N, H, J), jnp.float32),
            "b3": sc * jax.random.normal(ks[6], (N, 1, J), jnp.float32),
        }

    k_s, k_t = jax.random.split(key)
    return jm, sm, make_net(k_s), make_net(k_t)   # jts_nets (s), jts_nett (t)


# ----------------------------------------------------------------------------
# One-time host-side packing: fuse / pad / bf16-cast / stage-reverse weights
# into the kernel's streaming layout.
# ----------------------------------------------------------------------------
def pack_params(raw, jts_dim, shape_dim):
    jm, sm, s_net, t_net = raw
    N = jm.shape[0]
    J, S = jts_dim, shape_dim
    H = s_net["W2"].shape[-1]
    assert J <= JP and S <= K1 - JP, "joint/shape dims exceed packed layout"

    # Combined layer-1 input mask over the [z | shape] slab.
    cmask = jnp.zeros((N, 1, K1), jnp.float32)
    cmask = cmask.at[:, 0, :J].set(jm)
    cmask = cmask.at[:, 0, JP:JP + S].set(sm[:, None])
    # jm padded to JP (pad lanes exactly zero) for the z recombination.
    mjm = jnp.zeros((N, 1, JP), jnp.float32).at[:, 0, :J].set(jm)

    def pack_w1(p):
        W1 = jnp.zeros((N, K1, H), jnp.float32)
        W1 = W1.at[:, :J, :].set(p["W1"][:, :J, :])
        W1 = W1.at[:, JP:JP + S, :].set(p["W1"][:, J:J + S, :])
        return W1

    W1f = jnp.concatenate([pack_w1(s_net), pack_w1(t_net)], axis=-1)   # (N,128,2H)
    b1f = jnp.concatenate([s_net["b1"], t_net["b1"]], axis=-1)          # (N,1,2H)

    def pack_w3(p):
        W3 = jnp.zeros((N, H, JP), jnp.float32).at[:, :, :J].set(p["W3"])
        b3 = jnp.zeros((N, 1, JP), jnp.float32).at[:, :, :J].set(p["b3"])
        return W3, b3

    sW3, sb3 = pack_w3(s_net)
    tW3, tb3 = pack_w3(t_net)

    # forward_p runs stages in reverse; pre-reverse so the kernel grid
    # index_map is the identity and the HBM weight stream is sequential.
    rev = lambda a: a[::-1]

    return {
        "cmask": rev(cmask), "mjm": rev(mjm),
        "W1f": rev(W1f).astype(jnp.bfloat16),
        "b1f": rev(b1f).astype(jnp.float32),
        "sW2": rev(s_net["W2"]).astype(jnp.bfloat16),
        "sb2": rev(s_net["b2"]).astype(jnp.float32),
        "sW3": rev(sW3).astype(jnp.bfloat16), "sb3": rev(sb3),
        "tW2": rev(t_net["W2"]).astype(jnp.bfloat16),
        "tb2": rev(t_net["b2"]).astype(jnp.float32),
        "tW3": rev(tW3).astype(jnp.bfloat16), "tb3": rev(tb3),
    }


# ----------------------------------------------------------------------------
# Pure-JAX reference (mirrors ShapeCondRealNVP.forward_p).  weights_bf16=True
# matches the kernel's weight-dtype policy (tight tolerance); False is the
# original fp32 semantics (looser tolerance).
# ----------------------------------------------------------------------------
def reference_forward_p(x, shape, raw, weights_bf16):
    jm, sm, s_net, t_net = raw
    N = jm.shape[0]

    def dotw(a, w):
        if weights_bf16:
            return jnp.dot(a.astype(jnp.bfloat16), w.astype(jnp.bfloat16),
                           preferred_element_type=jnp.float32)
        return jnp.dot(a, w, preferred_element_type=jnp.float32)

    def cond(p, i, z_, sc, use_tanh):
        h = dotw(jnp.concatenate([z_, sc], axis=1), p["W1"][i]) + p["b1"][i]
        h = jnp.where(h >= 0, h, NEG_SLOPE * h)
        h = dotw(h, p["W2"][i]) + p["b2"][i]
        h = jnp.where(h >= 0, h, NEG_SLOPE * h)
        o = dotw(h, p["W3"][i]) + p["b3"][i]
        return jnp.tanh(o) if use_tanh else o

    z = x
    ld = jnp.zeros((x.shape[0],), jnp.float32)
    for i in reversed(range(N)):
        m = jm[i][None, :]
        one_m = 1.0 - m
        z_ = m * z
        sc = sm[i] * shape
        s = cond(s_net, i, z_, sc, True) * one_m
        t = cond(t_net, i, z_, sc, False) * one_m
        z = one_m * (z - t) * jnp.exp(-s) + z_
        ld = ld - jnp.sum(s, axis=1)
    return z, ld


if __name__ == "__main__":
    # 29 joints * 2 coords = 58 joint dims, 10 shape dims, num_stack=4 stages,
    # batch=2, hidden_dim=512 (CondNet default).
    B, J, S, N, H = 2, 58, 10, 4, 512

    key = jax.random.PRNGKey(0)
    k_par, k_x, k_shp = jax.random.split(key, 3)
    raw_params = init_params(k_par, J, S, N, H)
    packed_params = pack_params(raw_params, J, S)

    x = jax.random.normal(k_x, (B, J), jnp.float32)
    shape = jax.random.normal(k_shp, (B, S), jnp.float32)

    z, _, log_det = shape_cond_realnvp_forward_p(x, shape, packed_params)
    z = jax.block_until_ready(z)
    log_det = jax.block_until_ready(log_det)

    # Same-precision (bf16-weight) reference: tight tolerance.
    z_bf, ld_bf = reference_forward_p(x, shape, raw_params, weights_bf16=True)
    assert jnp.allclose(z, z_bf, rtol=2e-3, atol=2e-3), "z mismatch (bf16 ref)"
    assert jnp.allclose(log_det, ld_bf, rtol=2e-3, atol=2e-3), \
        "log_det mismatch (bf16 ref)"

    # Original fp32-weight semantics: looser tolerance (kernel stores bf16 weights).
    z_32, ld_32 = reference_forward_p(x, shape, raw_params, weights_bf16=False)
    assert jnp.allclose(z, z_32, rtol=5e-2, atol=5e-2), "z mismatch (fp32 ref)"
    assert jnp.allclose(log_det, ld_32, rtol=5e-2, atol=5e-2), \
        "log_det mismatch (fp32 ref)"

    print("KERNEL_OK")
</pallas_src>

<mosaic_0001>
module attributes {stable_mosaic.version = 11 : i64} {
  func.func @_stage_kernel(%arg0: i32, %arg1: memref<2x128xf32, #tpu.memory_space<vmem>>, %arg2: memref<1x1x128xf32, #tpu.memory_space<vmem>>, %arg3: memref<1x1x64xf32, #tpu.memory_space<vmem>>, %arg4: memref<1x128x1024xbf16, #tpu.memory_space<vmem>>, %arg5: memref<1x1x1024xf32, #tpu.memory_space<vmem>>, %arg6: memref<1x512x512xbf16, #tpu.memory_space<vmem>>, %arg7: memref<1x1x512xf32, #tpu.memory_space<vmem>>, %arg8: memref<1x512x64xbf16, #tpu.memory_space<vmem>>, %arg9: memref<1x1x64xf32, #tpu.memory_space<vmem>>, %arg10: memref<1x512x512xbf16, #tpu.memory_space<vmem>>, %arg11: memref<1x1x512xf32, #tpu.memory_space<vmem>>, %arg12: memref<1x512x64xbf16, #tpu.memory_space<vmem>>, %arg13: memref<1x1x64xf32, #tpu.memory_space<vmem>>, %arg14: memref<2x128xf32, #tpu.memory_space<vmem>>, %arg15: memref<2x1xf32, #tpu.memory_space<vmem>>, %arg16: memref<2x128xf32, #tpu.memory_space<vmem>>, %arg17: memref<2x1xf32, #tpu.memory_space<vmem>>) attributes {dimension_semantics = [#tpu.dimension_semantics<arbitrary>], iteration_bounds = array<i64: 4>, scalar_prefetch = 0 : i64, scratch_operands = 2 : i64, tpu.core_type = #tpu.core_type<tc>, window_params = [{pipeline_mode = #tpu.pipeline_mode<synchronous>, transform_indices = @transform_0, window_bounds = array<i64: 2, 128>}, {transform_indices = @transform_1, window_bounds = array<i64: 1, 1, 128>}, {transform_indices = @transform_2, window_bounds = array<i64: 1, 1, 64>}, {transform_indices = @transform_3, window_bounds = array<i64: 1, 128, 1024>}, {transform_indices = @transform_4, window_bounds = array<i64: 1, 1, 1024>}, {transform_indices = @transform_5, window_bounds = array<i64: 1, 512, 512>}, {transform_indices = @transform_6, window_bounds = array<i64: 1, 1, 512>}, {transform_indices = @transform_7, window_bounds = array<i64: 1, 512, 64>}, {transform_indices = @transform_8, window_bounds = array<i64: 1, 1, 64>}, {transform_indices = @transform_9, window_bounds = array<i64: 1, 512, 512>}, {transform_indices = @transform_10, window_bounds = array<i64: 1, 1, 512>}, {transform_indices = @transform_11, window_bounds = array<i64: 1, 512, 64>}, {transform_indices = @transform_12, window_bounds = array<i64: 1, 1, 64>}, {pipeline_mode = #tpu.pipeline_mode<synchronous>, transform_indices = @transform_13, window_bounds = array<i64: 2, 128>}, {pipeline_mode = #tpu.pipeline_mode<synchronous>, transform_indices = @transform_14, window_bounds = array<i64: 2, 1>}]} {
    %c0_i32 = arith.constant 0 : i32
    %0 = arith.cmpi eq, %arg0, %c0_i32 : i32
    %1 = arith.extui %0 : i1 to i32
    %c0_i32_0 = arith.constant 0 : i32
    %2 = arith.cmpi ne, %1, %c0_i32_0 : i32
    scf.if %2 {
      %c0_60 = arith.constant 0 : index
      %c0_61 = arith.constant 0 : index
      %94 = vector.load %arg1[%c0_60, %c0_61] : memref<2x128xf32, #tpu.memory_space<vmem>>, vector<2x128xf32>
      %c0_62 = arith.constant 0 : index
      %c0_63 = arith.constant 0 : index
      %95 = vector.load %arg16[%c0_62, %c0_63] : memref<2x128xf32, #tpu.memory_space<vmem>>, vector<2x128xf32>
      tpu.vector_store %arg16[%c0_62, %c0_63], %94 {strides = array<i32>} : memref<2x128xf32, #tpu.memory_space<vmem>>, vector<2x128xf32>,
      %cst_64 = arith.constant 0.000000e+00 : f32
      %96 = vector.broadcast %cst_64 : f32 to vector<2x1xf32>
      %c0_65 = arith.constant 0 : index
      %c0_66 = arith.constant 0 : index
      %97 = vector.load %arg17[%c0_65, %c0_66] : memref<2x1xf32, #tpu.memory_space<vmem>>, vector<2x1xf32>
      tpu.vector_store %arg17[%c0_65, %c0_66], %96 {strides = array<i32>} : memref<2x1xf32, #tpu.memory_space<vmem>>, vector<2x1xf32>,
    } else {
    }
    %c0 = arith.constant 0 : index
    %c0_1 = arith.constant 0 : index
    %3 = vector.load %arg16[%c0, %c0_1] : memref<2x128xf32, #tpu.memory_space<vmem>>, vector<2x128xf32>
    %c0_2 = arith.constant 0 : index
    %c0_3 = arith.constant 0 : index
    %c0_4 = arith.constant 0 : index
    %4 = vector.load %arg2[%c0_2, %c0_3, %c0_4] : memref<1x1x128xf32, #tpu.memory_space<vmem>>, vector<1x1x128xf32>
    %5 = vector.shape_cast %4 : vector<1x1x128xf32> to vector<1x128xf32>
    %6 = vector.broadcast %5 : vector<1x128xf32> to vector<2x128xf32>
    %7 = arith.mulf %3, %6 : vector<2x128xf32>
    %8 = arith.truncf %7 : vector<2x128xf32> to vector<2x128xbf16>
    %c0_5 = arith.constant 0 : index
    %c0_6 = arith.constant 0 : index
    %c0_7 = arith.constant 0 : index
    %9 = vector.load %arg4[%c0_5, %c0_6, %c0_7] : memref<1x128x1024xbf16, #tpu.memory_space<vmem>>, vector<1x128x1024xbf16>
    %10 = vector.shape_cast %9 : vector<1x128x1024xbf16> to vector<128x1024xbf16>
    %cst = arith.constant dense<0.000000e+00> : vector<2x1024xf32>
    %11 = tpu.matmul %8, %10, %cst {dimension_numbers = #tpu.dot_dimension_numbers<[1], [0], [0], [1], [0, 0, 1, 1], [], []>} : vector<2x128xbf16>, vector<128x1024xbf16>, vector<2x1024xf32> -> vector<2x1024xf32>
    %c0_8 = arith.constant 0 : index
    %c0_9 = arith.constant 0 : index
    %c0_10 = arith.constant 0 : index
    %12 = vector.load %arg5[%c0_8, %c0_9, %c0_10] : memref<1x1x1024xf32, #tpu.memory_space<vmem>>, vector<1x1x1024xf32>
    %13 = vector.shape_cast %12 : vector<1x1x1024xf32> to vector<1x1024xf32>
    %14 = vector.broadcast %13 : vector<1x1024xf32> to vector<2x1024xf32>
    %15 = arith.addf %11, %14 : vector<2x1024xf32>
    %cst_11 = arith.constant 0.000000e+00 : f32
    %16 = vector.broadcast %cst_11 : f32 to vector<2x1024xf32>
    %17 = arith.cmpf oge, %15, %16 : vector<2x1024xf32>
    %cst_12 = arith.constant 0.00999999977 : f32
    %18 = vector.broadcast %cst_12 : f32 to vector<2x1024xf32>
    %19 = arith.mulf %18, %15 : vector<2x1024xf32>
    %20 = arith.select %17, %15, %19 : vector<2x1024xi1>, vector<2x1024xf32>
    %21 = vector.extract_strided_slice %20 {offsets = [0, 0], sizes = [2, 512], strides = [1, 1]} : vector<2x1024xf32> to vector<2x512xf32>
    %22 = vector.extract_strided_slice %20 {offsets = [0, 512], sizes = [2, 512], strides = [1, 1]} : vector<2x1024xf32> to vector<2x512xf32>
    %c0_13 = arith.constant 0 : index
    %c0_14 = arith.constant 0 : index
    %c0_15 = arith.constant 0 : index
    %23 = vector.load %arg3[%c0_13, %c0_14, %c0_15] : memref<1x1x64xf32, #tpu.memory_space<vmem>>, vector<1x1x64xf32>
    %24 = vector.shape_cast %23 : vector<1x1x64xf32> to vector<1x64xf32>
    %cst_16 = arith.constant 1.000000e+00 : f32
    %25 = vector.broadcast %cst_16 : f32 to vector<1x64xf32>
    %26 = arith.subf %25, %24 : vector<1x64xf32>
    %27 = arith.truncf %21 : vector<2x512xf32> to vector<2x512xbf16>
    %c0_17 = arith.constant 0 : index
    %c0_18 = arith.constant 0 : index
    %c0_19 = arith.constant 0 : index
    %28 = vector.load %arg6[%c0_17, %c0_18, %c0_19] : memref<1x512x512xbf16, #tpu.memory_space<vmem>>, vector<1x512x512xbf16>
    %29 = vector.shape_cast %28 : vector<1x512x512xbf16> to vector<512x512xbf16>
    %cst_20 = arith.constant dense<0.000000e+00> : vector<2x512xf32>
    %30 = tpu.matmul %27, %29, %cst_20 {dimension_numbers = #tpu.dot_dimension_numbers<[1], [0], [0], [1], [0, 0, 1, 1], [], []>} : vector<2x512xbf16>, vector<512x512xbf16>, vector<2x512xf32> -> vector<2x512xf32>
    %c0_21 = arith.constant 0 : index
    %c0_22 = arith.constant 0 : index
    %c0_23 = arith.constant 0 : index
    %31 = vector.load %arg7[%c0_21, %c0_22, %c0_23] : memref<1x1x512xf32, #tpu.memory_space<vmem>>, vector<1x1x512xf32>
    %32 = vector.shape_cast %31 : vector<1x1x512xf32> to vector<1x512xf32>
    %33 = vector.broadcast %32 : vector<1x512xf32> to vector<2x512xf32>
    %34 = arith.addf %30, %33 : vector<2x512xf32>
    %cst_24 = arith.constant 0.000000e+00 : f32
    %35 = vector.broadcast %cst_24 : f32 to vector<2x512xf32>
    %36 = arith.cmpf oge, %34, %35 : vector<2x512xf32>
    %cst_25 = arith.constant 0.00999999977 : f32
    %37 = vector.broadcast %cst_25 : f32 to vector<2x512xf32>
    %38 = arith.mulf %37, %34 : vector<2x512xf32>
    %39 = arith.select %36, %34, %38 : vector<2x512xi1>, vector<2x512xf32>
    %40 = arith.truncf %39 : vector<2x512xf32> to vector<2x512xbf16>
    %c0_26 = arith.constant 0 : index
    %c0_27 = arith.constant 0 : index
    %c0_28 = arith.constant 0 : index
    %41 = vector.load %arg8[%c0_26, %c0_27, %c0_28] : memref<1x512x64xbf16, #tpu.memory_space<vmem>>, vector<1x512x64xbf16>
    %42 = vector.shape_cast %41 : vector<1x512x64xbf16> to vector<512x64xbf16>
    %cst_29 = arith.constant dense<0.000000e+00> : vector<2x64xf32>
    %43 = tpu.matmul %40, %42, %cst_29 {dimension_numbers = #tpu.dot_dimension_numbers<[1], [0], [0], [1], [0, 0, 1, 1], [], []>} : vector<2x512xbf16>, vector<512x64xbf16>, vector<2x64xf32> -> vector<2x64xf32>
    %c0_30 = arith.constant 0 : index
    %c0_31 = arith.constant 0 : index
    %c0_32 = arith.constant 0 : index
    %44 = vector.load %arg9[%c0_30, %c0_31, %c0_32] : memref<1x1x64xf32, #tpu.memory_space<vmem>>, vector<1x1x64xf32>
    %45 = vector.shape_cast %44 : vector<1x1x64xf32> to vector<1x64xf32>
    %46 = vector.broadcast %45 : vector<1x64xf32> to vector<2x64xf32>
    %47 = arith.addf %43, %46 : vector<2x64xf32>
    %48 = math.tanh %47 : vector<2x64xf32>
    %49 = vector.broadcast %26 : vector<1x64xf32> to vector<2x64xf32>
    %50 = arith.mulf %48, %49 : vector<2x64xf32>
    %51 = arith.truncf %22 : vector<2x512xf32> to vector<2x512xbf16>
    %c0_33 = arith.constant 0 : index
    %c0_34 = arith.constant 0 : index
    %c0_35 = arith.constant 0 : index
    %52 = vector.load %arg10[%c0_33, %c0_34, %c0_35] : memref<1x512x512xbf16, #tpu.memory_space<vmem>>, vector<1x512x512xbf16>
    %53 = vector.shape_cast %52 : vector<1x512x512xbf16> to vector<512x512xbf16>
    %cst_36 = arith.constant dense<0.000000e+00> : vector<2x512xf32>
    %54 = tpu.matmul %51, %53, %cst_36 {dimension_numbers = #tpu.dot_dimension_numbers<[1], [0], [0], [1], [0, 0, 1, 1], [], []>} : vector<2x512xbf16>, vector<512x512xbf16>, vector<2x512xf32> -> vector<2x512xf32>
    %c0_37 = arith.constant 0 : index
    %c0_38 = arith.constant 0 : index
    %c0_39 = arith.constant 0 : index
    %55 = vector.load %arg11[%c0_37, %c0_38, %c0_39] : memref<1x1x512xf32, #tpu.memory_space<vmem>>, vector<1x1x512xf32>
    %56 = vector.shape_cast %55 : vector<1x1x512xf32> to vector<1x512xf32>
    %57 = vector.broadcast %56 : vector<1x512xf32> to vector<2x512xf32>
    %58 = arith.addf %54, %57 : vector<2x512xf32>
    %cst_40 = arith.constant 0.000000e+00 : f32
    %59 = vector.broadcast %cst_40 : f32 to vector<2x512xf32>
    %60 = arith.cmpf oge, %58, %59 : vector<2x512xf32>
    %cst_41 = arith.constant 0.00999999977 : f32
    %61 = vector.broadcast %cst_41 : f32 to vector<2x512xf32>
    %62 = arith.mulf %61, %58 : vector<2x512xf32>
    %63 = arith.select %60, %58, %62 : vector<2x512xi1>, vector<2x512xf32>
    %64 = arith.truncf %63 : vector<2x512xf32> to vector<2x512xbf16>
    %c0_42 = arith.constant 0 : index
    %c0_43 = arith.constant 0 : index
    %c0_44 = arith.constant 0 : index
    %65 = vector.load %arg12[%c0_42, %c0_43, %c0_44] : memref<1x512x64xbf16, #tpu.memory_space<vmem>>, vector<1x512x64xbf16>
    %66 = vector.shape_cast %65 : vector<1x512x64xbf16> to vector<512x64xbf16>
    %cst_45 = arith.constant dense<0.000000e+00> : vector<2x64xf32>
    %67 = tpu.matmul %64, %66, %cst_45 {dimension_numbers = #tpu.dot_dimension_numbers<[1], [0], [0], [1], [0, 0, 1, 1], [], []>} : vector<2x512xbf16>, vector<512x64xbf16>, vector<2x64xf32> -> vector<2x64xf32>
    %c0_46 = arith.constant 0 : index
    %c0_47 = arith.constant 0 : index
    %c0_48 = arith.constant 0 : index
    %68 = vector.load %arg13[%c0_46, %c0_47, %c0_48] : memref<1x1x64xf32, #tpu.memory_space<vmem>>, vector<1x1x64xf32>
    %69 = vector.shape_cast %68 : vector<1x1x64xf32> to vector<1x64xf32>
    %70 = vector.broadcast %69 : vector<1x64xf32> to vector<2x64xf32>
    %71 = arith.addf %67, %70 : vector<2x64xf32>
    %72 = vector.broadcast %26 : vector<1x64xf32> to vector<2x64xf32>
    %73 = arith.mulf %71, %72 : vector<2x64xf32>
    %c0_49 = arith.constant 0 : index
    %c0_50 = arith.constant 0 : index
    %74 = vector.load %arg16[%c0_49, %c0_50] : memref<2x128xf32, #tpu.memory_space<vmem>>, vector<2x64xf32>
    %75 = arith.subf %74, %73 : vector<2x64xf32>
    %76 = vector.broadcast %26 : vector<1x64xf32> to vector<2x64xf32>
    %77 = arith.mulf %76, %75 : vector<2x64xf32>
    %cst_51 = arith.constant 0.000000e+00 : f32
    %78 = vector.broadcast %cst_51 : f32 to vector<2x64xf32>
    %79 = arith.subf %78, %50 : vector<2x64xf32>
    %80 = math.exp %79 : vector<2x64xf32>
    %81 = arith.mulf %77, %80 : vector<2x64xf32>
    %82 = vector.broadcast %24 : vector<1x64xf32> to vector<2x64xf32>
    %83 = arith.mulf %74, %82 : vector<2x64xf32>
    %84 = arith.addf %81, %83 : vector<2x64xf32>
    %c0_52 = arith.constant 0 : index
    %c0_53 = arith.constant 0 : index
    %85 = vector.load %arg16[%c0_52, %c0_53] : memref<2x128xf32, #tpu.memory_space<vmem>>, vector<2x64xf32>
    tpu.vector_store %arg16[%c0_52, %c0_53], %84 {strides = array<i32>} : memref<2x128xf32, #tpu.memory_space<vmem>>, vector<2x64xf32>,
    %c0_54 = arith.constant 0 : index
    %c0_55 = arith.constant 0 : index
    %86 = vector.load %arg17[%c0_54, %c0_55] : memref<2x1xf32, #tpu.memory_space<vmem>>, vector<2x1xf32>
    %cst_56 = arith.constant dense<0.000000e+00> : vector<2xf32>
    %87 = vector.multi_reduction <add>, %50, %cst_56 [1] : vector<2x64xf32> to vector<2xf32>
    %88 = vector.shape_cast %87 : vector<2xf32> to vector<2x1xf32>
    %89 = arith.subf %86, %88 : vector<2x1xf32>
    %c0_57 = arith.constant 0 : index
    %c0_58 = arith.constant 0 : index
    %90 = vector.load %arg17[%c0_57, %c0_58] : memref<2x1xf32, #tpu.memory_space<vmem>>, vector<2x1xf32>
    tpu.vector_store %arg17[%c0_57, %c0_58], %89 {strides = array<i32>} : memref<2x1xf32, #tpu.memory_space<vmem>>, vector<2x1xf32>,
    %c3_i32 = arith.constant 3 : i32
    %91 = arith.cmpi eq, %arg0, %c3_i32 : i32
    %92 = arith.extui %91 : i1 to i32
    %c0_i32_59 = arith.constant 0 : i32
    %93 = arith.cmpi ne, %92, %c0_i32_59 : i32
    scf.if %93 {
      %c0_60 = arith.constant 0 : index
      %c0_61 = arith.constant 0 : index
      %94 = vector.load %arg16[%c0_60, %c0_61] : memref<2x128xf32, #tpu.memory_space<vmem>>, vector<2x128xf32>
      %c0_62 = arith.constant 0 : index
      %c0_63 = arith.constant 0 : index
      %95 = vector.load %arg14[%c0_62, %c0_63] : memref<2x128xf32, #tpu.memory_space<vmem>>, vector<2x128xf32>
      tpu.vector_store %arg14[%c0_62, %c0_63], %94 {strides = array<i32>} : memref<2x128xf32, #tpu.memory_space<vmem>>, vector<2x128xf32>,
      %c0_64 = arith.constant 0 : index
      %c0_65 = arith.constant 0 : index
      %96 = vector.load %arg17[%c0_64, %c0_65] : memref<2x1xf32, #tpu.memory_space<vmem>>, vector<2x1xf32>
      %c0_66 = arith.constant 0 : index
      %c0_67 = arith.constant 0 : index
      %97 = vector.load %arg15[%c0_66, %c0_67] : memref<2x1xf32, #tpu.memory_space<vmem>>, vector<2x1xf32>
      tpu.vector_store %arg15[%c0_66, %c0_67], %96 {strides = array<i32>} : memref<2x1xf32, #tpu.memory_space<vmem>>, vector<2x1xf32>,
    } else {
    }
    return
  }
  func.func @transform_0(%arg0: i32) -> (i32, i32) {
    %c0_i32 = arith.constant 0 : i32
    %c0_i32_0 = arith.constant 0 : i32
    %c0_i32_1 = arith.constant 0 : i32
    return %c0_i32, %c0_i32_0 : i32, i32
  }
  func.func @transform_1(%arg0: i32) -> (i32, i32, i32) {
    %c0_i32 = arith.constant 0 : i32
    %c0_i32_0 = arith.constant 0 : i32
    %c0_i32_1 = arith.constant 0 : i32
    return %arg0, %c0_i32, %c0_i32_0 : i32, i32, i32
  }
  func.func @transform_2(%arg0: i32) -> (i32, i32, i32) {
    %c0_i32 = arith.constant 0 : i32
    %c0_i32_0 = arith.constant 0 : i32
    %c0_i32_1 = arith.constant 0 : i32
    return %arg0, %c0_i32, %c0_i32_0 : i32, i32, i32
  }
  func.func @transform_3(%arg0: i32) -> (i32, i32, i32) {
    %c0_i32 = arith.constant 0 : i32
    %c0_i32_0 = arith.constant 0 : i32
    %c0_i32_1 = arith.constant 0 : i32
    return %arg0, %c0_i32, %c0_i32_0 : i32, i32, i32
  }
  func.func @transform_4(%arg0: i32) -> (i32, i32, i32) {
    %c0_i32 = arith.constant 0 : i32
    %c0_i32_0 = arith.constant 0 : i32
    %c0_i32_1 = arith.constant 0 : i32
    return %arg0, %c0_i32, %c0_i32_0 : i32, i32, i32
  }
  func.func @transform_5(%arg0: i32) -> (i32, i32, i32) {
    %c0_i32 = arith.constant 0 : i32
    %c0_i32_0 = arith.constant 0 : i32
    %c0_i32_1 = arith.constant 0 : i32
    return %arg0, %c0_i32, %c0_i32_0 : i32, i32, i32
  }
  func.func @transform_6(%arg0: i32) -> (i32, i32, i32) {
    %c0_i32 = arith.constant 0 : i32
    %c0_i32_0 = arith.constant 0 : i32
    %c0_i32_1 = arith.constant 0 : i32
    return %arg0, %c0_i32, %c0_i32_0 : i32, i32, i32
  }
  func.func @transform_7(%arg0: i32) -> (i32, i32, i32) {
    %c0_i32 = arith.constant 0 : i32
    %c0_i32_0 = arith.constant 0 : i32
    %c0_i32_1 = arith.constant 0 : i32
    return %arg0, %c0_i32, %c0_i32_0 : i32, i32, i32
  }
  func.func @transform_8(%arg0: i32) -> (i32, i32, i32) {
    %c0_i32 = arith.constant 0 : i32
    %c0_i32_0 = arith.constant 0 : i32
    %c0_i32_1 = arith.constant 0 : i32
    return %arg0, %c0_i32, %c0_i32_0 : i32, i32, i32
  }
  func.func @transform_9(%arg0: i32) -> (i32, i32, i32) {
    %c0_i32 = arith.constant 0 : i32
    %c0_i32_0 = arith.constant 0 : i32
    %c0_i32_1 = arith.constant 0 : i32
    return %arg0, %c0_i32, %c0_i32_0 : i32, i32, i32
  }
  func.func @transform_10(%arg0: i32) -> (i32, i32, i32) {
    %c0_i32 = arith.constant 0 : i32
    %c0_i32_0 = arith.constant 0 : i32
    %c0_i32_1 = arith.constant 0 : i32
    return %arg0, %c0_i32, %c0_i32_0 : i32, i32, i32
  }
  func.func @transform_11(%arg0: i32) -> (i32, i32, i32) {
    %c0_i32 = arith.constant 0 : i32
    %c0_i32_0 = arith.constant 0 : i32
    %c0_i32_1 = arith.constant 0 : i32
    return %arg0, %c0_i32, %c0_i32_0 : i32, i32, i32
  }
  func.func @transform_12(%arg0: i32) -> (i32, i32, i32) {
    %c0_i32 = arith.constant 0 : i32
    %c0_i32_0 = arith.constant 0 : i32
    %c0_i32_1 = arith.constant 0 : i32
    return %arg0, %c0_i32, %c0_i32_0 : i32, i32, i32
  }
  func.func @transform_13(%arg0: i32) -> (i32, i32) {
    %c0_i32 = arith.constant 0 : i32
    %c0_i32_0 = arith.constant 0 : i32
    %c0_i32_1 = arith.constant 0 : i32
    return %c0_i32, %c0_i32_0 : i32, i32
  }
  func.func @transform_14(%arg0: i32) -> (i32, i32) {
    %c0_i32 = arith.constant 0 : i32
    %c0_i32_0 = arith.constant 0 : i32
    %c0_i32_1 = arith.constant 0 : i32
    return %c0_i32, %c0_i32_0 : i32, i32
  }
}

</mosaic_0001>

<bundles_post_ra>
// kernel: tpu_custom_call.1
= control target key start
LH: loop header
LB: loop body
LE: loop exit
PB: predicated region body
PF: predicated region fallthrough
CT: control target
= control target key end

     0   :  { %s6939_s0 = inlined_call_operand.hbm [shape: f32[2,128], index: 0, kind: input, shape index: {}]   ;;  %s6940_s1 = inlined_call_operand.hbm [shape: f32[4,1,128], index: 1, kind: input, shape index: {}]   ;;  %s6941_s2 = inlined_call_operand.hbm [shape: f32[4,1,64], index: 2, kind: input, shape index: {}]   ;;  %s6942_s3 = inlined_call_operand.vmem [shape: bf16[4,128,1024], index: 3, kind: input, shape index: {}]   ;;  %s6943_s4 = inlined_call_operand.hbm [shape: f32[4,1,1024], index: 4, kind: input, shape index: {}]   ;;  %s6944_s5 = inlined_call_operand.hbm [shape: bf16[4,512,512], index: 5, kind: input, shape index: {}]   ;;  %s6945_s6 = inlined_call_operand.hbm [shape: f32[4,1,512], index: 6, kind: input, shape index: {}]   ;;  %s6946_s7 = inlined_call_operand.vmem [shape: bf16[4,512,64], index: 7, kind: input, shape index: {}]   ;;  %s6947_s8 = inlined_call_operand.hbm [shape: f32[4,1,64], index: 8, kind: input, shape index: {}]   ;;  %s6948_s9 = inlined_call_operand.hbm [shape: bf16[4,512,512], index: 9, kind: input, shape index: {}]   ;;  %s6949_s10 = inlined_call_operand.hbm [shape: f32[4,1,512], index: 10, kind: input, shape index: {}]   ;;  %s6950_s11 = inlined_call_operand.vmem [shape: bf16[4,512,64], index: 11, kind: input, shape index: {}]   ;;  %s6951_s12 = inlined_call_operand.hbm [shape: f32[4,1,64], index: 12, kind: input, shape index: {}]   ;;  %s6952_s13 = inlined_call_operand.hbm [shape: f32[2,128], index: 13, kind: output, shape index: {0}]   ;;  %s6953_s14 = inlined_call_operand.vmem [shape: f32[2,1], index: 14, kind: output, shape index: {1}]  }
   0x1   :  { %6978 = sst [smem:[#allocation33_spill]] %s6940_s1 }
   0x2   :  { %6979 = sst [smem:[#allocation34_spill]] %s6941_s2 }
   0x3   :  { %6980 = sst [smem:[#allocation35_spill]] %s6942_s3 }
   0x4   :  { %6981 = sst [smem:[#allocation36_spill]] %s6943_s4 }
   0x5   :  { %6982 = sst [smem:[#allocation37_spill]] %s6945_s6 }
   0x6   :  { %6983 = sst [smem:[#allocation38_spill]] %s6946_s7 }
   0x7   :  { %6984 = sst [smem:[#allocation39_spill]] %s6948_s9 }
   0x8   :  { %6985 = sst [smem:[#allocation40_spill]] %s6950_s11 }
   0x9   :  { %6986 = sst [smem:[#allocation41_spill]] %s6952_s13 }
   0xa   :  { %6987 = sst [smem:[#allocation42_spill]] %s6953_s14 }
   0xb   :  { %20 = vsyncpa [#allocation5], 0 }
   0xc   :  { %21 = vsyncpa [#allocation8], 0 }
   0xd   :  { %23 = vsyncpa [#allocation8 + $0x1], 0 }
   0xe   :  { %24 = vsyncpa [#allocation11], 0 }
   0xf   :  { %26 = vsyncpa [#allocation11 + $0x1], 0 }
  0x10   :  { %27 = vsyncpa [#allocation14], 0 }
  0x11   :  { %29 = vsyncpa [#allocation14 + $0x1], 0 }
  0x12   :  { %30 = vsyncpa [#allocation17], 0 }
  0x13   :  { %32 = vsyncpa [#allocation17 + $0x1], 0 }
  0x14   :  { %33 = vsyncpa [#allocation20], 0 }
  0x15   :  { %35 = vsyncpa [#allocation20 + $0x1], 0 }
  0x16   :  { %36 = vsyncpa [#allocation6], 0  ;;  %s5981_s29 = smov 0   ;;  %s5983_s30 = smov 0  }
  0x17   :  { %s5985_s15 = smov 0   ;;  %s5987_s16 = smov 0  }
  0x18 LB: > { %6988 = sst [smem:[#allocation29_spill]] %s5885_s15  ;;  %s6002_s17 = sadd.s32 1, %s5889_s16   ;;  %s5889_s16 = sphi %s5987_s16, %s7031_s16   ;;  %s5885_s15 = sphi %s5985_s15, %s7033_s15   ;;  %s5881_s30 = sphi %s5983_s30, %s7035_s30   ;;  %s5877_s29 = sphi %s5981_s29, %s7034_s29  }
  0x19   : > { %6989 = sst [smem:[#allocation30_spill]] %s6002_s17  ;;  %s70_s18 = sadd.s32 1, %s5885_s15 }
  0x1a   : > { %s67_s19 = ssub.s32 %s5889_s16, %s6002_s17  ;;  %p77_p0 = scmp.ne.s32.totalorder %s5885_s15, %s5881_s30 }
  0x1b   : > { %p68_p1 = scmp.eq.s32.totalorder %s67_s19, 0  ;;  %p78_p2 = scmp.eq.s32.totalorder %s5889_s16, 0 }
  0x1c   : > { %p5011_p3 = scmp.lt.s32.totalorder %s5889_s16, 4  ;;  %s6015_s21 = sand.u32 1, %s5889_s16  }
  0x1d   : > { %s6012_s20 = scalar_select %p68_p1, %s5885_s15, %s70_s18  }
  0x1e   : > { %p79_p4 = por %p78_p2, %p77_p0  ;;  %s6018_s22 = sand.u32 1, %s5885_s15  }
  0x1f   : > { %6990 = sst [smem:[#allocation31_spill]] %s6012_s20  ;;  %s6021_s23 = sshll.u32 %s5889_s16, 4 }
  0x20   : > { %s6991_s1 = sld [smem:[#allocation33_spill]]  ;;  %s449_s27 = scalar_lea.vmem [#allocation7], %s6018_s22 }
  0x21   : > { %s456_s28 = sshll.u32 %s449_s27, 4  ;;  %p6032_p5 = pnand %p5011_p3, %p79_p4  ;;  %s6030_s28 = int_to_ptr.vmem [resolvable:$true] %s456_s28 }
  0x22   : > { %s6958_s20 = scalar_lea.sflag [#allocation8], %s6015_s21 }
  0x23   : > { %s6992_s18 = scalar_select %p6032_p5, 1, 0 }
  0x24   : > { %p6042_p7 = pneg %p6032_p5 }
  0x26   : > { %s6027_s26 = scalar_lea.hbm %s6991_s1, %s6021_s23  ;;  %s5512_s17 = scalar_lea.hbm %s6991_s1, 64 }
  0x27   : > { %s5507_s15 = scalar_lea.hbm %s6027_s26, 16  ;;  %p5513_p10 = scmp.lt.u32.totalorder %s6027_s26, %s6991_s1 }
  0x28   : > { %p5508_p6 = scmp.ne.s32.totalorder %s6027_s26, %s5507_s15  ;;  %p5514_p11 = scmp.lt.u32.totalorder %s5512_s17, %s5507_s15 }
  0x29   : > { %s6993_s24 = scalar_select %p6042_p7, 1, 0 }
  0x2a   : > { %p5510_p8 = pnand %p6042_p7, %p5508_p6  ;;  %p5515_p12 = por %p5514_p11, %p5513_p10 }
  0x2b   : > { %p5516_p13 = scmp.lt.u32.totalorder %s5507_s15, %s6027_s26 }
  0x2c   : > { %p5511_p9 = pneg %p5510_p8 }
  0x2d   : > { %p5517_p0 = por %p5516_p13, %p5515_p12 }
  0x2f   : > { %p5518_p1 = pnand %p5517_p0, %p5511_p9 }
  0x31   : > { %5521 = shalt.err (!%p5518_p1)
}
  0x32   : > { %s5522_s19 = scalar_lea.vmem %s6030_s28, 16  ;;  %s5891_s25 = smov [#allocation7]  }
  0x33   : > { %p5523_p2 = scmp.ne.s32.totalorder %s6030_s28, %s5522_s19  ;;  %s5527_s27 = sshll.u32 %s5891_s25, 4  ;;  %s5528_s27 = int_to_ptr.vmem [resolvable:$false] %s5527_s27 }
  0x34   : > { %s5529_s13 = scalar_lea.vmem %s5528_s27, 32  ;;  %p5530_p6 = scmp.lt.s32.totalorder %s6030_s28, %s5528_s27 }
  0x35   : > { %p5525_p3 = pnand %p5523_p2, %p6042_p7  ;;  %p5531_p8 = scmp.lt.s32.totalorder %s5529_s13, %s5522_s19 }
  0x37   : > { %p5526_p4 = pneg %p5525_p3  ;;  %p5532_p10 = por %p5531_p8, %p5530_p6 }
  0x39   : > { %p5533_p11 = pnand %p5532_p10, %p5526_p4 }
  0x3b   : > { %5536 = shalt.err (!%p5533_p11)
}
  0x3c   : > { %4985 = dma.hbm_to_vmem [thread:$0]  (!%p6032_p5), %s6027_s26, 16, %s6030_s28, %s6958_s20  }
  0x3d   : > { %s4832_s14 = sshll.u32 %s5889_s16, 7  ;;  %s6994_s15 = sshll.u32 %s6018_s22, 3 }
  0x3e   : > { %s492_s17 = scalar_lea.vmem [#allocation10], %s6994_s15  ;;  %s6995_s4 = sld [smem:[#allocation36_spill]] }
  0x3f   : > { %s500_s25 = sshll.u32 %s492_s17, 4  ;;  %s6961_s1 = scalar_lea.sflag [#allocation11], %s6015_s21  ;;  %s501_s25 = int_to_ptr.vmem [resolvable:$true] %s500_s25 }
  0x44   : > { %s6073_s13 = scalar_lea.hbm %s6995_s4, %s4832_s14  ;;  %s5542_s15 = scalar_lea.hbm %s6995_s4, 512 }
  0x45   : > { %s5537_s11 = scalar_lea.hbm %s6073_s13, 128  ;;  %p5543_p0 = scmp.lt.u32.totalorder %s6073_s13, %s6995_s4 }
  0x46   : > { %p5538_p9 = scmp.ne.s32.totalorder %s6073_s13, %s5537_s11  ;;  %p5544_p1 = scmp.lt.u32.totalorder %s5542_s15, %s5537_s11 }
  0x47   : > { %p5546_p3 = scmp.lt.u32.totalorder %s5537_s11, %s6073_s13 }
  0x48   : > { %p5540_p12 = pnand %p5538_p9, %p6042_p7  ;;  %p5545_p2 = por %p5544_p1, %p5543_p0 }
  0x4a   : > { %p5541_p13 = pneg %p5540_p12  ;;  %p5547_p4 = por %p5546_p3, %p5545_p2 }
  0x4c   : > { %p5548_p6 = pnand %p5547_p4, %p5541_p13 }
  0x4e   : > { %5551 = shalt.err (!%p5548_p6)
}
  0x4f   : > { %s5552_s14 = scalar_lea.vmem %s501_s25, 128  ;;  %s5892_s27 = smov [#allocation10]  }
  0x50   : > { %p5553_p8 = scmp.ne.s32.totalorder %s501_s25, %s5552_s14  ;;  %s5557_s19 = sshll.u32 %s5892_s27, 4  ;;  %s5558_s19 = int_to_ptr.vmem [resolvable:$false] %s5557_s19 }
  0x51   : > { %s5559_s26 = scalar_lea.vmem %s5558_s19, 256  ;;  %p5560_p9 = scmp.lt.s32.totalorder %s501_s25, %s5558_s19 }
  0x52   : > { %p5555_p10 = pnand %p5553_p8, %p6042_p7  ;;  %p5561_p12 = scmp.lt.s32.totalorder %s5559_s26, %s5552_s14 }
  0x54   : > { %p5556_p11 = pneg %p5555_p10  ;;  %p5562_p5 = por %p5561_p12, %p5560_p9 }
  0x56   : > { %p5563_p0 = pnand %p5562_p5, %p5556_p11 }
  0x58   : > { %5566 = shalt.err (!%p5563_p0)
}
  0x59   : > { %p6996_p1 = scmp.ne.s32.totalorder %s6992_s18, 0  ;;  %s6962_s11 = sshll.u32 %s6018_s22, 2 }
  0x5a   : > { %s6963_s20 = sshll.u32 %s5889_s16, 6  ;;  %s6997_s6 = sld [smem:[#allocation37_spill]] }
  0x5b   : > { %4991 = dma.hbm_to_vmem [thread:$0]  (!%p6996_p1), %s6073_s13, 128, %s501_s25, %s6961_s1  }
  0x5c   : > { %s532_s14 = scalar_lea.vmem [#allocation13], %s6962_s11  ;;  %s6965_s19 = scalar_lea.sflag [#allocation14], %s6015_s21 }
  0x5d   : > { %s540_s27 = sshll.u32 %s532_s14, 4  ;;  %s541_s27 = int_to_ptr.vmem [resolvable:$true] %s540_s27 }
  0x60   : > { %s6102_s17 = scalar_lea.hbm %s6997_s6, %s6963_s20  ;;  %s5572_s28 = scalar_lea.hbm %s6997_s6, 256 }
  0x61   : > { %s5567_s26 = scalar_lea.hbm %s6102_s17, 64  ;;  %p5573_p3 = scmp.lt.u32.totalorder %s6102_s17, %s6997_s6 }
  0x62   : > { %p5568_p5 = scmp.ne.s32.totalorder %s6102_s17, %s5567_s26  ;;  %p5574_p4 = scmp.lt.u32.totalorder %s5572_s28, %s5567_s26 }
  0x63   : > { %p5576_p8 = scmp.lt.u32.totalorder %s5567_s26, %s6102_s17 }
  0x64   : > { %p5570_p13 = pnand %p5568_p5, %p6042_p7  ;;  %p5575_p6 = por %p5574_p4, %p5573_p3 }
  0x66   : > { %p5571_p2 = pneg %p5570_p13  ;;  %p5577_p10 = por %p5576_p8, %p5575_p6 }
  0x68   : > { %p5578_p11 = pnand %p5577_p10, %p5571_p2 }
  0x6a   : > { %5581 = shalt.err (!%p5578_p11)
}
  0x6b   : > { %s5582_s14 = scalar_lea.vmem %s541_s27, 64  ;;  %s5893_s11 = smov [#allocation13]  }
  0x6c   : > { %p5583_p9 = scmp.ne.s32.totalorder %s541_s27, %s5582_s14  ;;  %s5587_s20 = sshll.u32 %s5893_s11, 4  ;;  %s5588_s20 = int_to_ptr.vmem [resolvable:$false] %s5587_s20 }
  0x6d   : > { %s5589_s25 = scalar_lea.vmem %s5588_s20, 128  ;;  %p5590_p5 = scmp.lt.s32.totalorder %s541_s27, %s5588_s20 }
  0x6e   : > { %p5585_p12 = pnand %p5583_p9, %p6042_p7  ;;  %p5591_p13 = scmp.lt.s32.totalorder %s5589_s25, %s5582_s14 }
  0x70   : > { %p5586_p0 = pneg %p5585_p12  ;;  %p5592_p1 = por %p5591_p13, %p5590_p5 }
  0x72   : > { %p5593_p3 = pnand %p5592_p1, %p5586_p0 }
  0x74   : > { %5596 = shalt.err (!%p5593_p3)
}
  0x75   : > { %p6998_p4 = scmp.ne.s32.totalorder %s6992_s18, 0  ;;  %s6999_s1 = sshll.u32 %s5889_s16, 6 }
  0x76   : > { %s6131_s20 = scalar_lea.hbm %s6949_s10, %s6999_s1  ;;  %s4412_s13 = sshll.u32 %s6018_s22, 10 }
  0x77   : > { %4997 = dma.hbm_to_vmem [thread:$0]  (!%p6998_p4), %s6102_s17, 64, %s541_s27, %s6965_s19  }
  0x78   : > { %s4833_s28 = sshll.u32 %s5889_s16, 14  ;;  %s511_s4 = scalar_lea.vmem [#allocation12], %s4412_s13 }
  0x79   : > { %s6138_s25 = scalar_lea.hbm %s6944_s5, %s4833_s28  ;;  %s518_s6 = sshll.u32 %s511_s4, 4  ;;  %s6140_s6 = int_to_ptr.vmem [resolvable:$true] %s518_s6 }
  0x7a   : > { %s7000_s9 = sld [smem:[#allocation39_spill]]  ;;  %s576_s27 = scalar_lea.vmem [#allocation16], %s4412_s13 }
  0x7b   : > { %s583_s1 = sshll.u32 %s576_s27, 4  ;;  %s6964_s11 = scalar_lea.sflag [#allocation17], %s6015_s21  ;;  %s6147_s1 = int_to_ptr.vmem [resolvable:$true] %s583_s1 }
  0x80   : > { %s6145_s17 = scalar_lea.hbm %s7000_s9, %s4833_s28  ;;  %s5602_s3 = scalar_lea.hbm %s7000_s9, 65536 }
  0x81   : > { %s5597_s26 = scalar_lea.hbm %s6145_s17, 16384  ;;  %p5603_p8 = scmp.lt.u32.totalorder %s6145_s17, %s7000_s9 }
  0x82   : > { %p5598_p1 = scmp.ne.s32.totalorder %s6145_s17, %s5597_s26  ;;  %p5604_p10 = scmp.lt.u32.totalorder %s5602_s3, %s5597_s26 }
  0x83   : > { %p5606_p9 = scmp.lt.u32.totalorder %s5597_s26, %s6145_s17 }
  0x84   : > { %p5600_p2 = pnand %p5598_p1, %p6042_p7  ;;  %p5605_p11 = por %p5604_p10, %p5603_p8 }
  0x86   : > { %p5601_p6 = pneg %p5600_p2  ;;  %p5607_p12 = por %p5606_p9, %p5605_p11 }
  0x88   : > { %p5608_p0 = pnand %p5607_p12, %p5601_p6 }
  0x8a   : > { %5611 = shalt.err (!%p5608_p0)
}
  0x8b   : > { %s5612_s13 = scalar_lea.vmem %s6147_s1, 16384  ;;  %s5894_s14 = smov [#allocation16]  }
  0x8c   : > { %p5613_p5 = scmp.ne.s32.totalorder %s6147_s1, %s5612_s13  ;;  %s5617_s27 = sshll.u32 %s5894_s14, 4  ;;  %s5618_s27 = int_to_ptr.vmem [resolvable:$false] %s5617_s27 }
  0x8d   : > { %s5619_s4 = scalar_lea.vmem %s5618_s27, 32768  ;;  %p5620_p1 = scmp.lt.s32.totalorder %s6147_s1, %s5618_s27 }
  0x8e   : > { %p5615_p13 = pnand %p5613_p5, %p6042_p7  ;;  %p5621_p2 = scmp.lt.s32.totalorder %s5619_s4, %s5612_s13 }
  0x90   : > { %p5616_p3 = pneg %p5615_p13  ;;  %p5622_p8 = por %p5621_p2, %p5620_p1 }
  0x92   : > { %p5623_p10 = pnand %p5622_p8, %p5616_p3 }
  0x94   : > { %5626 = shalt.err (!%p5623_p10)
}
  0x95   : > { %s6966_s26 = smov 256   ;;  %s6969_s15 = smov 16  }
  0x96   : > { %5003 = dma.hbm_to_vmem [thread:$0]  (!%p6998_p4), %s6145_s17, 16384, %s6147_s1, %s6964_s11, %s6966_s26, %s6966_s26, %s6969_s15  }
  0x97   : > { %s6177_s3 = sadd.s32 4294967295, %s5889_s16   ;;  %p83_p6 = scmp.ne.s32.totalorder %s5881_s30, %s5877_s29 }
  0x98   : > { %p6967_p11 = scmp.eq.s32.totalorder %s6177_s3, 0  ;;  %p4404_p9 = scmp.ge.s32.totalorder %s5889_s16, 1 }
  0x99   : > { %p422_p12 = scmp.lt.s32.totalorder %s5889_s16, 5  ;;  %s5897_s17 = smov [#allocation4]  }
  0x9a   : > { %p6187_p5 = por %p6967_p11, %p83_p6  ;;  %s435_s1 = sshll.u32 %s5897_s17, 4  ;;  %s6195_s1 = int_to_ptr.vmem [resolvable:$true] %s435_s1 }
  0x9b   : > { %p6191_p13 = pnand %p4404_p9, %p422_p12  ;;  %s7004_s2 = sld [smem:[#allocation34_spill]] }
  0x9c   : > { %s7001_s7 = scalar_select %p6187_p5, 1, 0 }
  0x9d   : > { %s7003_s28 = scalar_select %p6191_p13, 1, 0 }
  0x9e   : > { %7002 = sst [smem:[#allocation32_spill]] %s7001_s7  ;;  %p4978_p3 = pneg %p6191_p13 }
  0x9f   : > { %s466_s14 = scalar_lea.vmem [#allocation9], %s6018_s22 }
  0xa0   : > { %s473_s27 = sshll.u32 %s466_s14, 4  ;;  %p6208_p1 = pnand %p4978_p3, %p6967_p11  ;;  %s474_s27 = int_to_ptr.vmem [resolvable:$true] %s473_s27 }
  0xa1   : > { %s6203_s16 = scalar_lea.hbm %s7004_s2, %s6021_s23  ;;  %s5632_s11 = scalar_lea.hbm %s7004_s2, 64 }
  0xa2   : > { %s7005_s4 = scalar_select %p6208_p1, 1, 0 }
  0xa3   : > { %s5627_s17 = scalar_lea.hbm %s6203_s16, 16  ;;  %p5633_p6 = scmp.lt.u32.totalorder %s6203_s16, %s7004_s2 }
  0xa4   : > { %p5628_p2 = scmp.ne.s32.totalorder %s6203_s16, %s5627_s17  ;;  %p5634_p9 = scmp.lt.u32.totalorder %s5632_s11, %s5627_s17 }
  0xa5   : > { %p5636_p3 = scmp.lt.u32.totalorder %s5627_s17, %s6203_s16 }
  0xa6   : > { %p5630_p8 = pnand %p5628_p2, %p6042_p7  ;;  %p5635_p12 = por %p5634_p9, %p5633_p6 }
  0xa8   : > { %p5631_p10 = pneg %p5630_p8  ;;  %p5637_p0 = por %p5636_p3, %p5635_p12 }
  0xaa   : > { %p5638_p11 = pnand %p5637_p0, %p5631_p10 }
  0xac   : > { %5641 = shalt.err (!%p5638_p11)
}
  0xad   : > { %s5642_s14 = scalar_lea.vmem %s474_s27, 16  ;;  %s5898_s15 = smov [#allocation9]  }
  0xae   : > { %p5643_p5 = scmp.ne.s32.totalorder %s474_s27, %s5642_s14  ;;  %s5647_s9 = sshll.u32 %s5898_s15, 4  ;;  %s5648_s9 = int_to_ptr.vmem [resolvable:$false] %s5647_s9 }
  0xaf   : > { %s5649_s29 = scalar_lea.vmem %s5648_s9, 32  ;;  %p5650_p13 = scmp.lt.s32.totalorder %s474_s27, %s5648_s9 }
  0xb0   : > { %p5645_p2 = pnand %p5643_p5, %p6042_p7  ;;  %p5651_p1 = scmp.lt.s32.totalorder %s5649_s29, %s5642_s14 }
  0xb2   : > { %p5646_p8 = pneg %p5645_p2  ;;  %p5652_p4 = por %p5651_p1, %p5650_p13 }
  0xb4   : > { %p5653_p6 = pnand %p5652_p4, %p5646_p8 }
  0xb6   : > { %5656 = shalt.err (!%p5653_p6)
}
  0xb7   : > { %p7006_p9 = scmp.ne.s32.totalorder %s6992_s18, 0  ;;  %s7007_s19 = scalar_lea.sflag [#allocation8], %s6015_s21 }
  0xb8   : > { %s6235_s17 = scalar_lea.hbm %s6947_s8, %s6021_s23  ;;  %s5657_s9 = scalar_lea.hbm %s6939_s0, 32 }
  0xb9   : > { %4988 = dma.hbm_to_vmem [thread:$0]  (!%p7006_p9), %s6203_s16, 16, %s474_s27, %s7007_s19  }
  0xba   : > { %p5658_p4 = scmp.ne.s32.totalorder %s6939_s0, %s5657_s9  ;;  %p7008_p11 = scmp.ne.s32.totalorder %s7005_s4, 0 }
  0xbb   : > { %p5664_p1 = scmp.lt.u32.totalorder %s5657_s9, %s6939_s0 }
  0xbc   : > { %p5659_p0 = pneg %p7008_p11 }
  0xbe   : > { %p5660_p5 = pnand %p5659_p0, %p5658_p4 }
  0xc0   : > { %p5661_p13 = pneg %p5660_p5 }
  0xc2   : > { %p5666_p10 = pnand %p5664_p1, %p5661_p13 }
  0xc4   : > { %5669 = shalt.err (!%p5666_p10)
}
  0xc5   : > { %s5670_s16 = scalar_lea.vmem %s6195_s1, 32  ;;  %p5678_p8 = scmp.lt.s32.totalorder %s6195_s1, %s6195_s1 }
  0xc6   : > { %p5671_p12 = scmp.ne.s32.totalorder %s6195_s1, %s5670_s16  ;;  %p5679_p6 = scmp.lt.s32.totalorder %s5670_s16, %s5670_s16 }
  0xc8   : > { %p5673_p3 = pnand %p5671_p12, %p5659_p0  ;;  %p5680_p9 = por %p5679_p6, %p5678_p8 }
  0xca   : > { %p5674_p2 = pneg %p5673_p3 }
  0xcc   : > { %p5681_p7 = pnand %p5680_p9, %p5674_p2 }
  0xce   : > { %5684 = shalt.err (!%p5681_p7)
}
  0xcf   : > { %4981 = dma.hbm_to_vmem [thread:$0]  (!%p7008_p11), %s6939_s0, 32, %s6195_s1, [#allocation5]  }
  0xd0   : > { %s5685_s27 = scalar_lea.hbm %s6138_s25, 16384  ;;  %p7009_p0 = scmp.ne.s32.totalorder %s6993_s24, 0 }
  0xd1   : > { %p5686_p4 = scmp.ne.s32.totalorder %s6138_s25, %s5685_s27  ;;  %s5690_s26 = scalar_lea.hbm %s6944_s5, 65536 }
  0xd2   : > { %p5691_p7 = scmp.lt.u32.totalorder %s6138_s25, %s6944_s5  ;;  %p5692_p9 = scmp.lt.u32.totalorder %s5690_s26, %s5685_s27 }
  0xd3   : > { %p5688_p5 = pnand %p5686_p4, %p7009_p0  ;;  %p5694_p10 = scmp.lt.u32.totalorder %s5685_s27, %s6138_s25 }
  0xd4   : > { %p5693_p1 = por %p5692_p9, %p5691_p7 }
  0xd5   : > { %p5689_p13 = pneg %p5688_p5 }
  0xd6   : > { %p5695_p12 = por %p5694_p10, %p5693_p1 }
  0xd8   : > { %p5696_p3 = pnand %p5695_p12, %p5689_p13 }
  0xda   : > { %5699 = shalt.err (!%p5696_p3)
}
  0xdb   : > { %s5700_s1 = scalar_lea.vmem %s6140_s6, 16384  ;;  %s5899_s13 = smov [#allocation12]  }
  0xdc   : > { %p5701_p11 = scmp.ne.s32.totalorder %s6140_s6, %s5700_s1  ;;  %s5705_s9 = sshll.u32 %s5899_s13, 4  ;;  %s5706_s9 = int_to_ptr.vmem [resolvable:$false] %s5705_s9 }
  0xdd   : > { %s5707_s14 = scalar_lea.vmem %s5706_s9, 32768  ;;  %p5708_p6 = scmp.lt.s32.totalorder %s6140_s6, %s5706_s9 }
  0xde   : > { %p5703_p2 = pnand %p5701_p11, %p7009_p0  ;;  %p5709_p4 = scmp.lt.s32.totalorder %s5707_s14, %s5700_s1 }
  0xe0   : > { %p5704_p8 = pneg %p5703_p2  ;;  %p5710_p5 = por %p5709_p4, %p5708_p6 }
  0xe2   : > { %p5711_p7 = pnand %p5710_p5, %p5704_p8 }
  0xe4   : > { %5714 = shalt.err (!%p5711_p7)
}
  0xe5   : > { %p7010_p13 = scmp.ne.s32.totalorder %s6992_s18, 0  ;;  %s7011_s29 = smov 16  }
  0xe6   : > { %s7012_s16 = smov 256   ;;  %s7013_s2 = scalar_lea.sflag [#allocation11], %s6015_s21 }
  0xe7   : > { %4994 = dma.hbm_to_vmem [thread:$0]  (!%p7010_p13), %s6138_s25, 16384, %s6140_s6, %s7013_s2, %s7012_s16, %s7012_s16, %s7011_s29  }
  0xe8   : > { %s558_s7 = scalar_lea.vmem [#allocation15], %s6018_s22  ;;  %s7014_s19 = sshll.u32 %s6018_s22, 2 }
  0xe9   : > { %s565_s27 = sshll.u32 %s558_s7, 4  ;;  %s597_s11 = scalar_lea.vmem [#allocation18], %s7014_s19  ;;  %s566_s27 = int_to_ptr.vmem [resolvable:$true] %s565_s27 }
  0xea   : > { %s605_s26 = sshll.u32 %s597_s11, 4  ;;  %s5715_s4 = scalar_lea.hbm %s6235_s17, 16  ;;  %s6287_s26 = int_to_ptr.vmem [resolvable:$true] %s605_s26 }
  0xeb   : > { %p5716_p9 = scmp.ne.s32.totalorder %s6235_s17, %s5715_s4  ;;  %s5720_s13 = scalar_lea.hbm %s6947_s8, 64 }
  0xec   : > { %p5721_p12 = scmp.lt.u32.totalorder %s6235_s17, %s6947_s8  ;;  %p5722_p3 = scmp.lt.u32.totalorder %s5720_s13, %s5715_s4 }
  0xed   : > { %p5718_p1 = pnand %p5716_p9, %p7009_p0  ;;  %p5724_p2 = scmp.lt.u32.totalorder %s5715_s4, %s6235_s17 }
  0xee   : > { %p5723_p11 = por %p5722_p3, %p5721_p12 }
  0xef   : > { %p5719_p10 = pneg %p5718_p1 }
  0xf0   : > { %p5725_p8 = por %p5724_p2, %p5723_p11 }
  0xf2   : > { %p5726_p6 = pnand %p5725_p8, %p5719_p10 }
  0xf4   : > { %5729 = shalt.err (!%p5726_p6)
}
  0xf5   : > { %s5730_s6 = scalar_lea.vmem %s566_s27, 16  ;;  %s5900_s25 = smov [#allocation15]  }
  0xf6   : > { %p5731_p4 = scmp.ne.s32.totalorder %s566_s27, %s5730_s6  ;;  %s5735_s29 = sshll.u32 %s5900_s25, 4  ;;  %s5736_s29 = int_to_ptr.vmem [resolvable:$false] %s5735_s29 }
  0xf7   : > { %s5737_s16 = scalar_lea.vmem %s5736_s29, 32  ;;  %p5738_p9 = scmp.lt.s32.totalorder %s566_s27, %s5736_s29 }
  0xf8   : > { %p5733_p5 = pnand %p5731_p4, %p7009_p0  ;;  %p5739_p1 = scmp.lt.s32.totalorder %s5737_s16, %s5730_s6 }
  0xfa   : > { %p5734_p7 = pneg %p5733_p5  ;;  %p5740_p13 = por %p5739_p1, %p5738_p9 }
  0xfc   : > { %p5741_p3 = pnand %p5740_p13, %p5734_p7 }
  0xfe   : > { %5744 = shalt.err (!%p5741_p3)
}
  0xff   : > { %p7015_p12 = scmp.ne.s32.totalorder %s6992_s18, 0  ;;  %s7016_s2 = scalar_lea.sflag [#allocation14], %s6015_s21 }
 0x100   : > { %s5745_s7 = scalar_lea.hbm %s6131_s20, 64  ;;  %s5750_s4 = scalar_lea.hbm %s6949_s10, 256 }
 0x101   : > { %5000 = dma.hbm_to_vmem [thread:$0]  (!%p7015_p12), %s6235_s17, 16, %s566_s27, %s7016_s2  }
 0x102   : > { %p5746_p10 = scmp.ne.s32.totalorder %s6131_s20, %s5745_s7  ;;  %p5751_p13 = scmp.lt.u32.totalorder %s6131_s20, %s6949_s10 }
 0x103   : > { %p5752_p8 = scmp.lt.u32.totalorder %s5750_s4, %s5745_s7  ;;  %p5754_p4 = scmp.lt.u32.totalorder %s5745_s7, %s6131_s20 }
 0x104   : > { %p5748_p11 = pnand %p5746_p10, %p7009_p0 }
 0x105   : > { %p5753_p6 = por %p5752_p8, %p5751_p13 }
 0x106   : > { %p5749_p2 = pneg %p5748_p11 }
 0x107   : > { %p5755_p5 = por %p5754_p4, %p5753_p6 }
 0x109   : > { %p5756_p7 = pnand %p5755_p5, %p5749_p2 }
 0x10b   : > { %5759 = shalt.err (!%p5756_p7)
}
 0x10c   : > { %s5760_s17 = scalar_lea.vmem %s6287_s26, 64  ;;  %s5901_s27 = smov [#allocation18]  }
 0x10d   : > { %p5761_p9 = scmp.ne.s32.totalorder %s6287_s26, %s5760_s17  ;;  %s5765_s13 = sshll.u32 %s5901_s27, 4  ;;  %s5766_s13 = int_to_ptr.vmem [resolvable:$false] %s5765_s13 }
 0x10e   : > { %s5767_s9 = scalar_lea.vmem %s5766_s13, 128  ;;  %p5768_p10 = scmp.lt.s32.totalorder %s6287_s26, %s5766_s13 }
 0x10f   : > { %p5763_p1 = pnand %p5761_p9, %p7009_p0  ;;  %p5769_p11 = scmp.lt.s32.totalorder %s5767_s9, %s5760_s17 }
 0x111   : > { %p5764_p3 = pneg %p5763_p1  ;;  %p5770_p13 = por %p5769_p11, %p5768_p10 }
 0x113   : > { %p5771_p8 = pnand %p5770_p13, %p5764_p3 }
 0x115   : > { %5774 = shalt.err (!%p5771_p8)
}
 0x116   : > { %s7017_s14 = scalar_lea.sflag [#allocation17], %s6015_s21  ;;  %s6335_s29 = scalar_lea.hbm %s6951_s12, %s6021_s23 }
 0x117   : > { %5006 = dma.hbm_to_vmem [thread:$0]  (!%p7015_p12), %s6131_s20, 64, %s6287_s26, %s7017_s14  }
 0x118   : > { %s623_s16 = scalar_lea.vmem [#allocation19], %s6018_s22  ;;  %s621_s21 = scalar_lea.sflag [#allocation20], %s6018_s22 }
 0x119   : > { %s630_s2 = sshll.u32 %s623_s16, 4  ;;  %s5775_s7 = scalar_lea.hbm %s6335_s29, 16  ;;  %s631_s2 = int_to_ptr.vmem [resolvable:$true] %s630_s2 }
 0x11a   : > { %p5776_p2 = scmp.ne.s32.totalorder %s6335_s29, %s5775_s7  ;;  %s5780_s26 = scalar_lea.hbm %s6951_s12, 64 }
 0x11b   : > { %p5781_p5 = scmp.lt.u32.totalorder %s6335_s29, %s6951_s12  ;;  %p5782_p7 = scmp.lt.u32.totalorder %s5780_s26, %s5775_s7 }
 0x11c   : > { %p5778_p6 = pnand %p5776_p2, %p7009_p0  ;;  %p5784_p1 = scmp.lt.u32.totalorder %s5775_s7, %s6335_s29 }
 0x11d   : > { %p5783_p9 = por %p5782_p7, %p5781_p5 }
 0x11e   : > { %p5779_p4 = pneg %p5778_p6 }
 0x11f   : > { %p5785_p3 = por %p5784_p1, %p5783_p9 }
 0x121   : > { %p5786_p10 = pnand %p5785_p3, %p5779_p4 }
 0x123   : > { %5789 = shalt.err (!%p5786_p10)
}
 0x124   : > { %s5790_s22 = scalar_lea.vmem %s631_s2, 16  ;;  %s5902_s4 = smov [#allocation19]  }
 0x125   : > { %p5791_p11 = scmp.ne.s32.totalorder %s631_s2, %s5790_s22  ;;  %s5795_s15 = sshll.u32 %s5902_s4, 4  ;;  %s5796_s15 = int_to_ptr.vmem [resolvable:$false] %s5795_s15 }
 0x126   : > { %s5797_s1 = scalar_lea.vmem %s5796_s15, 32  ;;  %p5798_p2 = scmp.lt.s32.totalorder %s631_s2, %s5796_s15 }
 0x127   : > { %p5793_p13 = pnand %p5791_p11, %p7009_p0  ;;  %p5799_p6 = scmp.lt.s32.totalorder %s5797_s1, %s5790_s22 }
 0x129   : > { %p5794_p8 = pneg %p5793_p13  ;;  %p5800_p12 = por %p5799_p6, %p5798_p2 }
 0x12b   : > { %p5801_p5 = pnand %p5800_p12, %p5794_p8 }
 0x12d   : > { %5804 = shalt.err (!%p5801_p5)
}
 0x12e   : > { %p7018_p7 = scmp.ne.s32.totalorder %s6992_s18, 0  ;;  %p7019_p4 = scmp.ne.s32.totalorder %s7003_s28, 0 }
 0x12f   : > { %p7020_p9 = scmp.eq.s32.totalorder (!%p7019_p4), %s6177_s3, 0 }
 0x130   : > { %5009 = dma.hbm_to_vmem [thread:$0]  (!%p7018_p7), %s6335_s29, 16, %s631_s2, %s621_s21  }
 0x131   : > { %639 = sbr.rel (%p7019_p4) target bundleno = 1506 (0x5e2), region = 72 }
 0x138   : > { %5848 = dma.done.wait (%p7020_p9), [#allocation5], 32   ;;  %p7021_p0 = pmov %p7020_p9 }
 0x139   : > { %s7022_s24 = sld [smem:[#allocation32_spill]]  ;;  %s645_s17 = sand.u32 1, %s6177_s3  }
 0x13a   : > { %5850 = vsyncadd (%p7021_p0), [#allocation5], 4294967264  ;;  %s6364_s27 = sand.u32 1, %s5881_s30   ;;  %s646_s13 = scalar_lea.sflag [#allocation8], %s645_s17 }
 0x13b   : > { %s648_s18 = scalar_lea.vmem [#allocation7], %s6364_s27 }
 0x13f   : > { %p7023_p12 = scmp.ne.s32.totalorder %s7022_s24, 0 }
 0x141   : > { %5852 = dma.done.wait (%p7023_p12), %s646_s13, 32  }
 0x142   : > { %5854 = vsyncadd (%p7023_p12), %s646_s13, 4294967264  ;;  %s4428_s28 = sshll.u32 %s6364_s27, 3  ;;  %s656_s9 = scalar_lea.vmem [#allocation9], %s6364_s27 }
 0x143   : > { %s662_s14 = scalar_lea.sflag [#allocation11], %s645_s17  ;;  %s6373_s6 = scalar_lea.vmem [#allocation10], %s4428_s28 }
 0x144   : > { %5856 = dma.done.wait (%p7023_p12), %s662_s14, 16512  }
 0x145   : > { %5858 = vsyncadd (%p7023_p12), %s662_s14, 4294950784  ;;  %s4429_s25 = sshll.u32 %s6364_s27, 10  ;;  %s4430_s29 = sshll.u32 %s6364_s27, 2 }
 0x146   : > { %s6381_s16 = scalar_lea.vmem [#allocation12], %s4429_s25  ;;  %s680_s2 = scalar_lea.sflag [#allocation14], %s645_s17 }
 0x147   : > { %s6383_s21 = scalar_lea.vmem [#allocation13], %s4430_s29 }
 0x148   : > { %5860 = dma.done.wait (%p7023_p12), %s680_s2, 80  }
 0x149   : > { %5862 = vsyncadd (%p7023_p12), %s680_s2, 4294967216  ;;  %s691_s7 = scalar_lea.vmem [#allocation15], %s6364_s27  ;;  %s697_s19 = scalar_lea.sflag [#allocation17], %s645_s17 }
 0x14a   : > { %s6390_s20 = scalar_lea.vmem [#allocation16], %s4429_s25 }
 0x14b   : > { %5864 = dma.done.wait (%p7023_p12), %s697_s19, 16448  }
 0x14c   : > { %5866 = vsyncadd (%p7023_p12), %s697_s19, 4294950848  ;;  %s6396_s26 = scalar_lea.vmem [#allocation18], %s4430_s29  ;;  %s715_s11 = scalar_lea.sflag [#allocation20], %s6364_s27 }
 0x14d   : > { %5868 = dma.done.wait (%p7023_p12), %s715_s11, 16  }
 0x14e   : > { %5870 = vsyncadd (%p7023_p12), %s715_s11, 4294967280  ;;  %p808_p1 = scmp.lt.s32.totalorder %s6177_s3, 3  ;;  %s7024_s13 = sld [smem:[#allocation35_spill]] }
 0x14f   : > { %s7025_s29 = sld [smem:[#allocation38_spill]]  ;;  %s7026_s24 = sld [smem:[#allocation40_spill]] }
 0x150   : > { %s809_s22 = scalar_select %p808_p1, %s6177_s3, 3 }
 0x151   : > { %p7027_p3 = scmp.ne.s32.totalorder %s6177_s3, 0 }
 0x152   : > { %s4837_s4 = sshll.u32 %s809_s22, 9  ;;  %s4838_s15 = sshll.u32 %s809_s22, 8  ;;  %v828_v0 = vld [vmem:[#allocation4] sm:$0x3] (!%p7027_p3)  ;;  %vm830_vm0 = vcmask (!%p7027_p3), 1024   ;;  %v5903_v1 = vmov (!%p7027_p3), 0.0  }
 0x153   : > { %827 = sbr.rel (%p7027_p3) target bundleno = 346 (0x15a), region = 116  ;;  %829 = vst [vmem:[#allocation2] sm:$0x3] (!%p7027_p3), %v828_v0  ;;  %831 = vst.msk [vmem:[#allocation3] sm:$0x3] (!%p7027_p3), %vm830_vm0, %v5903_v1 }
 0x154   : > { %s6409_s28 = scalar_lea.vmem %s7024_s13, %s4837_s4 }
 0x155   : > { %s6414_s2 = scalar_lea.vmem %s7025_s29, %s4838_s15  ;;  %s6419_s11 = scalar_lea.vmem %s7026_s24, %s4838_s15 }
 0x15a PF: > { %v842_v2 = vld [vmem:[%s6409_s28] sm:$0xff]  ;;  %v5904_v8 = vmov 0   ;;  %v843_v16 = vld [vmem:[%s6409_s28 + $0x8] sm:$0xff]  ;;  %v844_v61 = vld [vmem:[%s6409_s28 + $0x10] sm:$0xff]  ;;  %vm4115_vm13 = vcmask 517120   ;;  %p4827_p10 = scmp.ne.s32.totalorder %s6177_s3, 3 }
 0x15b   : > { %v846_v3 = vld [vmem:[%s6409_s28 + $0x20] sm:$0xff]  ;;  %1300 = vmatprep.mubr.bf16.mxu0 %v5904_v8  ;;  %1341 = vmatprep.mubr.bf16.mxu1 %v5904_v8  ;;  %v847_v17 = vld [vmem:[%s6409_s28 + $0x28] sm:$0xff]  ;;  %v848_v63 = vld [vmem:[%s6409_s28 + $0x30] sm:$0xff] }
 0x15c   : > { %v850_v4 = vld [vmem:[%s6409_s28 + $0x40] sm:$0xff]  ;;  %v4442_v5 = vcombine.high %v842_v2, %v846_v3  ;;  %v4441_v6 = vcombine.low %v842_v2, %v846_v3  ;;  %v851_v18 = vld [vmem:[%s6409_s28 + $0x48] sm:$0xff]  ;;  %v4444_v19 = vcombine.high %v843_v16, %v847_v17  ;;  %v4443_v20 = vcombine.low %v843_v16, %v847_v17  ;;  %v860_v16 = vld [vmem:[%s6409_s28 + $0x90] sm:$0xff] }
 0x15d   : > { %v854_v7 = vld [vmem:[%s6409_s28 + $0x60] sm:$0xff]  ;;  %v855_v21 = vld [vmem:[%s6409_s28 + $0x68] sm:$0xff] }
 0x15e   : > { %v4450_v9 = vcombine.high %v850_v4, %v854_v7  ;;  %v858_v10 = vld [vmem:[%s6409_s28 + $0x80] sm:$0xff]  ;;  %1268 = vmatprep.subr.bf16.mxu0 %v4442_v5  ;;  %v4449_v12 = vcombine.low %v850_v4, %v854_v7  ;;  %v4452_v23 = vcombine.high %v851_v18, %v855_v21  ;;  %v859_v24 = vld [vmem:[%s6409_s28 + $0x88] sm:$0xff]  ;;  %1309 = vmatprep.subr.bf16.mxu1 %v4444_v19 }
 0x15f   : > { %v862_v11 = vld [vmem:[%s6409_s28 + $0xa0] sm:$0xff]  ;;  %1269 = vmatpush1.bf16.msra.mxu0 %v4441_v6  ;;  %v863_v25 = vld [vmem:[%s6409_s28 + $0xa8] sm:$0xff]  ;;  %1310 = vmatpush1.bf16.msra.mxu1 %v4443_v20  ;;  %v4451_v29 = vcombine.low %v851_v18, %v855_v21  ;;  %v4446_v5 = vcombine.high %v844_v61, %v848_v63  ;;  %v852_v6 = vld [vmem:[%s6409_s28 + $0x50] sm:$0xff] }
 0x160   : > { %1270 = vmatprep.subr.bf16.mxu0 %v4450_v9  ;;  %v4458_v13 = vcombine.high %v858_v10, %v862_v11  ;;  %v866_v14 = vld [vmem:[%s6409_s28 + $0xc0] sm:$0xff]  ;;  %v4457_v22 = vcombine.low %v858_v10, %v862_v11  ;;  %1311 = vmatprep.subr.bf16.mxu1 %v4452_v23  ;;  %v4460_v30 = vcombine.high %v859_v24, %v863_v25  ;;  %v867_v32 = vld [vmem:[%s6409_s28 + $0xc8] sm:$0xff]  ;;  %v856_v9 = vld [vmem:[%s6409_s28 + $0x70] sm:$0xff] }
 0x161   : > { %v870_v15 = vld [vmem:[%s6409_s28 + $0xe0] sm:$0xff]  ;;  %v871_v33 = vld [vmem:[%s6409_s28 + $0xe8] sm:$0xff]  ;;  %v4459_v37 = vcombine.low %v859_v24, %v863_v25  ;;  %v864_v18 = vld [vmem:[%s6409_s28 + $0xb0] sm:$0xff]  ;;  %v4453_v20 = vcombine.low %v852_v6, %v856_v9 }
 0x162   : > { %v4466_v26 = vcombine.high %v866_v14, %v870_v15  ;;  %v874_v27 = vld [vmem:[%s6409_s28 + $0x100] sm:$0xff]  ;;  %v4465_v31 = vcombine.low %v866_v14, %v870_v15  ;;  %v4468_v38 = vcombine.high %v867_v32, %v871_v33  ;;  %v875_v40 = vld [vmem:[%s6409_s28 + $0x108] sm:$0xff]  ;;  %v4467_v45 = vcombine.low %v867_v32, %v871_v33  ;;  %v849_v14 = vld [vmem:[%s6409_s28 + $0x38] sm:$0xff] }
 0x163   : > { %1271 = vmatpush1.bf16.msra.mxu0 %v4449_v12  ;;  %v878_v28 = vld [vmem:[%s6409_s28 + $0x120] sm:$0xff]  ;;  %1312 = vmatpush1.bf16.msra.mxu1 %v4451_v29  ;;  %v879_v41 = vld [vmem:[%s6409_s28 + $0x128] sm:$0xff]  ;;  %v4445_v12 = vcombine.low %v844_v61, %v848_v63  ;;  %v4454_v15 = vcombine.high %v852_v6, %v856_v9  ;;  %v853_v21 = vld [vmem:[%s6409_s28 + $0x58] sm:$0xff]  ;;  %v4462_v23 = vcombine.high %v860_v16, %v864_v18 }
 0x164   : > { %1272 = vmatprep.subr.bf16.mxu0 %v4458_v13  ;;  %v4474_v34 = vcombine.high %v874_v27, %v878_v28  ;;  %v882_v35 = vld [vmem:[%s6409_s28 + $0x140] sm:$0xff]  ;;  %1313 = vmatprep.subr.bf16.mxu1 %v4460_v30  ;;  %v4473_v39 = vcombine.low %v874_v27, %v878_v28  ;;  %v4476_v46 = vcombine.high %v875_v40, %v879_v41  ;;  %v883_v48 = vld [vmem:[%s6409_s28 + $0x148] sm:$0xff]  ;;  %v845_v13 = vld [vmem:[%s6409_s28 + $0x18] sm:$0xff] }
 0x165   : > { %v886_v36 = vld [vmem:[%s6409_s28 + $0x160] sm:$0xff]  ;;  %v887_v49 = vld [vmem:[%s6409_s28 + $0x168] sm:$0xff]  ;;  %v4475_v54 = vcombine.low %v875_v40, %v879_v41  ;;  %v4448_v19 = vcombine.high %v845_v13, %v849_v14  ;;  %v868_v24 = vld [vmem:[%s6409_s28 + $0xd0] sm:$0xff]  ;;  %v4447_v25 = vcombine.low %v845_v13, %v849_v14  ;;  %v4461_v28 = vcombine.low %v860_v16, %v864_v18 }
 0x166   : > { %v4482_v42 = vcombine.high %v882_v35, %v886_v36  ;;  %v890_v43 = vld [vmem:[%s6409_s28 + $0x180] sm:$0xff]  ;;  %v4481_v47 = vcombine.low %v882_v35, %v886_v36  ;;  %v4484_v56 = vcombine.high %v883_v48, %v887_v49  ;;  %v891_v58 = vld [vmem:[%s6409_s28 + $0x188] sm:$0xff]  ;;  %v4483_v62 = vcombine.low %v883_v48, %v887_v49  ;;  %v861_v29 = vld [vmem:[%s6409_s28 + $0x98] sm:$0xff] }
 0x167   : > { %1273 = vmatpush1.bf16.msra.mxu0 %v4457_v22  ;;  %v894_v44 = vld [vmem:[%s6409_s28 + $0x1a0] sm:$0xff]  ;;  %1314 = vmatpush1.bf16.msra.mxu1 %v4459_v37  ;;  %v895_v59 = vld [vmem:[%s6409_s28 + $0x1a8] sm:$0xff]  ;;  %v857_v22 = vld [vmem:[%s6409_s28 + $0x78] sm:$0xff] }
 0x168   : > { %1274 = vmatprep.subr.bf16.mxu0 %v4466_v26  ;;  %1315 = vmatprep.subr.bf16.mxu1 %v4468_v38  ;;  %v4490_v50 = vcombine.high %v890_v43, %v894_v44  ;;  %v898_v51 = vld [vmem:[%s6409_s28 + $0x1c0] sm:$0xff]  ;;  %v4489_v57 = vcombine.low %v890_v43, %v894_v44  ;;  %v4492_v1 = vcombine.high %v891_v58, %v895_v59  ;;  %v899_v3 = vld [vmem:[%s6409_s28 + $0x1c8] sm:$0xff]  ;;  %v872_v26 = vld [vmem:[%s6409_s28 + $0xf0] sm:$0xff] }
 0x169   : > { %v902_v52 = vld [vmem:[%s6409_s28 + $0x1e0] sm:$0xff]  ;;  %v903_v4 = vld [vmem:[%s6409_s28 + $0x1e8] sm:$0xff]  ;;  %v4491_v7 = vcombine.low %v891_v58, %v895_v59  ;;  %v4456_v27 = vcombine.high %v853_v21, %v857_v22  ;;  %v865_v30 = vld [vmem:[%s6409_s28 + $0xb8] sm:$0xff]  ;;  %v4455_v33 = vcombine.low %v853_v21, %v857_v22  ;;  %v4469_v36 = vcombine.low %v868_v24, %v872_v26 }
 0x16a   : > { %v832_v53 = vld [vmem:[#allocation2] sm:$0x3]  ;;  %v4498_v60 = vcombine.high %v898_v51, %v902_v52  ;;  %v4497_v2 = vcombine.low %v898_v51, %v902_v52  ;;  %v4500_v11 = vcombine.high %v899_v3, %v903_v4  ;;  %v4499_v17 = vcombine.low %v899_v3, %v903_v4  ;;  %v876_v32 = vld [vmem:[%s6409_s28 + $0x110] sm:$0xff]  ;;  %v869_v37 = vld [vmem:[%s6409_s28 + $0xd8] sm:$0xff] }
 0x16b   : > { %1275 = vmatpush1.bf16.msra.mxu0 %v4465_v31  ;;  %1316 = vmatpush1.bf16.msra.mxu1 %v4467_v45  ;;  %v4440_v55 = vld [vmem:[%s648_s18] ss:$0 sm:$0xff]  ;;  %v4470_v31 = vcombine.high %v868_v24, %v872_v26  ;;  %v4464_v35 = vcombine.high %v861_v29, %v865_v30  ;;  %v873_v38 = vld [vmem:[%s6409_s28 + $0xf8] sm:$0xff]  ;;  %v884_v40 = vld [vmem:[%s6409_s28 + $0x150] sm:$0xff]  ;;  %v4463_v41 = vcombine.low %v861_v29, %v865_v30  ;;  %s7028_s18 = scalar_lea.vmem [#allocation19], %s6364_s27 }
 0x16c   : > { %1276 = vmatprep.subr.bf16.mxu0 %v4474_v34  ;;  %1317 = vmatprep.subr.bf16.mxu1 %v4476_v46  ;;  %v840_v0 = vmul.f32 %v4440_v55, %v832_v53  ;;  %v880_v34 = vld [vmem:[%s6409_s28 + $0x130] sm:$0xff]  ;;  %v4472_v43 = vcombine.high %v869_v37, %v873_v38  ;;  %v877_v44 = vld [vmem:[%s6409_s28 + $0x118] sm:$0xff]  ;;  %v4471_v48 = vcombine.low %v869_v37, %v873_v38 }
 0x16d   : > { %v881_v45 = vld [vmem:[%s6409_s28 + $0x138] sm:$0xff]  ;;  %v896_v49 = vld [vmem:[%s6409_s28 + $0x1b0] sm:$0xff] }
 0x16e   : > { %v6463_v10 = vpack.c.bf16 %v840_v0, %v840_v0  ;;  %v885_v52 = vld [vmem:[%s6409_s28 + $0x158] sm:$0xff]  ;;  %v900_v55 = vld [vmem:[%s6409_s28 + $0x1d0] sm:$0xff] }
 0x16f   : > { %1277 = vmatpush1.bf16.msra.mxu0 %v4473_v39  ;;  %1318 = vmatpush1.bf16.msra.mxu1 %v4475_v54  ;;  %v4478_v39 = vcombine.high %v876_v32, %v880_v34  ;;  %v889_v53 = vld [vmem:[%s6409_s28 + $0x178] sm:$0xff]  ;;  %v5074_v26 = vld [vmem:[%s6381_s16 + $0x68] ss:$16 sps:$4 sm:$0xff]  }
 0x170   : > { %1278 = vmatprep.subr.bf16.mxu0 %v4482_v42  ;;  %1319 = vmatprep.subr.bf16.mxu1 %v4484_v56  ;;  %v888_v42 = vld [vmem:[%s6409_s28 + $0x170] sm:$0xff]  ;;  %v4479_v56 = vcombine.low %v877_v44, %v881_v45  ;;  %v4488_v58 = vcombine.high %v885_v52, %v889_v53  ;;  %v897_v61 = vld [vmem:[%s6409_s28 + $0x1b8] sm:$0xff]  ;;  %v4487_v63 = vcombine.low %v885_v52, %v889_v53 }
 0x171   : > { %v4486_v46 = vcombine.high %v884_v40, %v888_v42  ;;  %v4485_v51 = vcombine.low %v884_v40, %v888_v42  ;;  %v901_v0 = vld [vmem:[%s6409_s28 + $0x1d8] sm:$0xff]  ;;  %v5080_v30 = vld [vmem:[%s6381_s16 + $0x88] ss:$16 sps:$4 sm:$0xff]  }
 0x172   : > { %v5055_v3 = vld [vmem:[%s6381_s16 + $0x4] ss:$16 sps:$4 sm:$0xff]   ;;  %v5053_v6 = vld [vmem:[%s6381_s16] ss:$16 sps:$4 sm:$0xff]   ;;  %v5064_v16 = vld [vmem:[%s6381_s16 + $0x2c] ss:$16 sps:$4 sm:$0xff]  }
 0x173   : > { %1279 = vmatpush1.bf16.msra.mxu0 %v4481_v47  ;;  %1320 = vmatpush1.bf16.msra.mxu1 %v4483_v62  ;;  %v892_v47 = vld [vmem:[%s6409_s28 + $0x190] sm:$0xff]  ;;  %v5059_v13 = vld [vmem:[%s6381_s16 + $0x20] ss:$16 sps:$4 sm:$0xff]  }
 0x174   : > { %1280 = vmatprep.subr.bf16.mxu0 %v4490_v50  ;;  %1321 = vmatprep.subr.bf16.mxu1 %v4492_v1  ;;  %v4480_v50 = vcombine.high %v877_v44, %v881_v45  ;;  %v4494_v54 = vcombine.high %v892_v47, %v896_v49  ;;  %v4493_v59 = vcombine.low %v892_v47, %v896_v49  ;;  %v5061_v9 = vld [vmem:[%s6381_s16 + $0x24] ss:$16 sps:$4 sm:$0xff]   ;;  %v5071_v21 = vld [vmem:[%s6381_s16 + $0x60] ss:$16 sps:$4 sm:$0xff]   ;;  %v5076_v24 = vld [vmem:[%s6381_s16 + $0x6c] ss:$16 sps:$4 sm:$0xff]  }
 0x175   : > { %v5067_v14 = vld [vmem:[%s6381_s16 + $0x44] ss:$16 sps:$4 sm:$0xff]   ;;  %v5092_v38 = vld [vmem:[%s6381_s16 + $0xc8] ss:$16 sps:$4 sm:$0xff]   ;;  %v5101_v40 = vld [vmem:[%s6381_s16 + $0x100] ss:$16 sps:$4 sm:$0xff]  }
 0x176   : > { %v5073_v18 = vld [vmem:[%s6381_s16 + $0x64] ss:$16 sps:$4 sm:$0xff]   ;;  %v5098_v42 = vld [vmem:[%s6381_s16 + $0xe8] ss:$16 sps:$4 sm:$0xff]   ;;  %v5113_v47 = vld [vmem:[%s6381_s16 + $0x140] ss:$16 sps:$4 sm:$0xff]  }
 0x177   : > { %1281 = vmatpush1.bf16.msra.mxu0 %v4489_v57  ;;  %1322 = vmatpush1.bf16.msra.mxu1 %v4491_v7  ;;  %v904_v57 = vld [vmem:[%s6409_s28 + $0x1f0] sm:$0xff] }
 0x178   : > { %1282 = vmatprep.subr.bf16.mxu0 %v4498_v60  ;;  %1323 = vmatprep.subr.bf16.mxu1 %v4500_v11  ;;  %v893_v60 = vld [vmem:[%s6409_s28 + $0x198] sm:$0xff]  ;;  %v4502_v62 = vcombine.high %v900_v55, %v904_v57  ;;  %v4501_v4 = vcombine.low %v900_v55, %v904_v57  ;;  %v5104_v45 = vld [vmem:[%s6381_s16 + $0x108] ss:$16 sps:$4 sm:$0xff]  }
 0x179   : > { %v4496_v1 = vcombine.high %v893_v60, %v897_v61  ;;  %v5058_v11 = vld [vmem:[%s6381_s16 + $0xc] ss:$16 sps:$4 sm:$0xff]   ;;  %v5079_v22 = vld [vmem:[%s6381_s16 + $0x84] ss:$16 sps:$4 sm:$0xff]   ;;  %v5110_v49 = vld [vmem:[%s6381_s16 + $0x128] ss:$16 sps:$4 sm:$0xff]  }
 0x17a   : > { %v5091_v29 = vld [vmem:[%s6381_s16 + $0xc4] ss:$16 sps:$4 sm:$0xff]   ;;  %v5116_v53 = vld [vmem:[%s6381_s16 + $0x148] ss:$16 sps:$4 sm:$0xff]   ;;  %v5125_v55 = vld [vmem:[%s6381_s16 + $0x180] ss:$16 sps:$4 sm:$0xff]  }
 0x17b   : > { %1283 = vmatpush1.bf16.msra.mxu0 %v4497_v2  ;;  %1324 = vmatpush1.bf16.msra.mxu1 %v4499_v17  ;;  %v905_v2 = vld [vmem:[%s6409_s28 + $0x1f8] sm:$0xff]  ;;  %v5122_v57 = vld [vmem:[%s6381_s16 + $0x168] ss:$16 sps:$4 sm:$0xff]  }
 0x17c   : > { %1350 = vmatprep.subr.bf16.mxu0 %v4446_v5  ;;  %1391 = vmatprep.subr.bf16.mxu1 %v4448_v19  ;;  %v4495_v5 = vcombine.low %v893_v60, %v897_v61  ;;  %v4504_v7 = vcombine.high %v901_v0, %v905_v2  ;;  %v5065_v17 = vld [vmem:[%s6381_s16 + $0x40] ss:$16 sps:$4 sm:$0xff]   ;;  %v5062_v19 = vld [vmem:[%s6381_s16 + $0x28] ss:$16 sps:$4 sm:$0xff]   ;;  %v5103_v37 = vld [vmem:[%s6381_s16 + $0x104] ss:$16 sps:$4 sm:$0xff]  }
 0x17d   : > { %v5115_v44 = vld [vmem:[%s6381_s16 + $0x144] ss:$16 sps:$4 sm:$0xff]   ;;  %v5128_v60 = vld [vmem:[%s6381_s16 + $0x188] ss:$16 sps:$4 sm:$0xff]  }
 0x17e   : > { %1301 = vmatmul.mubr.bf16.vlgmr.msra.gmra.mrb[0].mxu0 %v6463_v10  ;;  %1342 = vmatmul.mubr.bf16.vlgmr.msra.gmra.mrb[0].mxu1 %v6463_v10  ;;  %v5127_v52 = vld [vmem:[%s6381_s16 + $0x184] ss:$16 sps:$4 sm:$0xff]  }
 0x17f   : > { %1351 = vmatpush1.bf16.msra.mxu0 %v4445_v12  ;;  %1382 = vmatprep.mubr.bf16.mxu0 %v5904_v8  ;;  %v4503_v12 = vcombine.low %v901_v0, %v905_v2  ;;  %v5139_v61 = vld [vmem:[%s6381_s16 + $0x1c4] ss:$16 sps:$4 sm:$0xff]   ;;  %v5134_v0 = vld [vmem:[%s6381_s16 + $0x1a8] ss:$16 sps:$4 sm:$0xff]   ;;  %v5142_v2 = vld [vmem:[%s6381_s16 + $0x1cc] ss:$16 sps:$4 sm:$0xff]  }
 0x180   : > { %1352 = vmatprep.subr.bf16.mxu0 %v4454_v15  ;;  %1392 = vmatpush1.bf16.msra.mxu1 %v4447_v25  ;;  %v5056_v15 = vld [vmem:[%s6381_s16 + $0x8] ss:$16 sps:$4 sm:$0xff]   ;;  %v5077_v25 = vld [vmem:[%s6381_s16 + $0x80] ss:$16 sps:$4 sm:$0xff]  }
 0x181   : > { %1423 = vmatprep.mubr.bf16.mxu1 %v5904_v8  ;;  %1393 = vmatprep.subr.bf16.mxu1 %v4456_v27  ;;  %v4477_v8 = vcombine.low %v876_v32, %v880_v34  ;;  %v5082_v27 = vld [vmem:[%s6381_s16 + $0x8c] ss:$16 sps:$4 sm:$0xff]   ;;  %v5089_v32 = vld [vmem:[%s6381_s16 + $0xc0] ss:$16 sps:$4 sm:$0xff]   ;;  %v5086_v34 = vld [vmem:[%s6381_s16 + $0xa8] ss:$16 sps:$4 sm:$0xff]  }
 0x183   : > { %1353 = vmatpush1.bf16.msra.mxu0 %v4453_v20  ;;  %v5070_v20 = vld [vmem:[%s6381_s16 + $0x4c] ss:$16 sps:$4 sm:$0xff]  }
 0x184   : > { %1354 = vmatprep.subr.bf16.mxu0 %v4462_v23  ;;  %1394 = vmatpush1.bf16.msra.mxu1 %v4455_v33  ;;  %v5068_v23 = vld [vmem:[%s6381_s16 + $0x48] ss:$16 sps:$4 sm:$0xff]   ;;  %v5097_v33 = vld [vmem:[%s6381_s16 + $0xe4] ss:$16 sps:$4 sm:$0xff]  }
 0x185   : > { %1395 = vmatprep.subr.bf16.mxu1 %v4464_v35  ;;  %v5094_v35 = vld [vmem:[%s6381_s16 + $0xcc] ss:$16 sps:$4 sm:$0xff]  }
 0x187   : > { %1355 = vmatpush1.bf16.msra.mxu0 %v4461_v28  ;;  %v5083_v28 = vld [vmem:[%s6381_s16 + $0xa0] ss:$16 sps:$4 sm:$0xff]  }
 0x188   : > { %1356 = vmatprep.subr.bf16.mxu0 %v4470_v31  ;;  %1396 = vmatpush1.bf16.msra.mxu1 %v4463_v41  ;;  %v5088_v31 = vld [vmem:[%s6381_s16 + $0xac] ss:$16 sps:$4 sm:$0xff]   ;;  %v5109_v41 = vld [vmem:[%s6381_s16 + $0x124] ss:$16 sps:$4 sm:$0xff]  }
 0x189   : > { %1397 = vmatprep.subr.bf16.mxu1 %v4472_v43  ;;  %v5106_v43 = vld [vmem:[%s6381_s16 + $0x10c] ss:$16 sps:$4 sm:$0xff]  }
 0x18b   : > { %1357 = vmatpush1.bf16.msra.mxu0 %v4469_v36  ;;  %v5095_v36 = vld [vmem:[%s6381_s16 + $0xe0] ss:$16 sps:$4 sm:$0xff]  }
 0x18c   : > { %1358 = vmatprep.subr.bf16.mxu0 %v4478_v39  ;;  %1398 = vmatpush1.bf16.msra.mxu1 %v4471_v48  ;;  %v5100_v39 = vld [vmem:[%s6381_s16 + $0xec] ss:$16 sps:$4 sm:$0xff]   ;;  %v5121_v48 = vld [vmem:[%s6381_s16 + $0x164] ss:$16 sps:$4 sm:$0xff]  }
 0x18d   : > { %1399 = vmatprep.subr.bf16.mxu1 %v4480_v50  ;;  %v5118_v50 = vld [vmem:[%s6381_s16 + $0x14c] ss:$16 sps:$4 sm:$0xff]  }
 0x18f   : > { %1359 = vmatpush1.bf16.msra.mxu0 %v4477_v8  ;;  %v5107_v8 = vld [vmem:[%s6381_s16 + $0x120] ss:$16 sps:$4 sm:$0xff]  }
 0x190   : > { %1360 = vmatprep.subr.bf16.mxu0 %v4486_v46  ;;  %1400 = vmatpush1.bf16.msra.mxu1 %v4479_v56  ;;  %v5112_v46 = vld [vmem:[%s6381_s16 + $0x12c] ss:$16 sps:$4 sm:$0xff]   ;;  %v5133_v56 = vld [vmem:[%s6381_s16 + $0x1a4] ss:$16 sps:$4 sm:$0xff]  }
 0x191   : > { %1401 = vmatprep.subr.bf16.mxu1 %v4488_v58  ;;  %v5130_v58 = vld [vmem:[%s6381_s16 + $0x18c] ss:$16 sps:$4 sm:$0xff]  }
 0x193   : > { %1361 = vmatpush1.bf16.msra.mxu0 %v4485_v51  ;;  %v5119_v51 = vld [vmem:[%s6381_s16 + $0x160] ss:$16 sps:$4 sm:$0xff]  }
 0x194   : > { %1362 = vmatprep.subr.bf16.mxu0 %v4494_v54  ;;  %1402 = vmatpush1.bf16.msra.mxu1 %v4487_v63  ;;  %v5124_v54 = vld [vmem:[%s6381_s16 + $0x16c] ss:$16 sps:$4 sm:$0xff]   ;;  %v5137_v63 = vld [vmem:[%s6381_s16 + $0x1c0] ss:$16 sps:$4 sm:$0xff]  }
 0x195   : > { %1403 = vmatprep.subr.bf16.mxu1 %v4496_v1  ;;  %v5145_v1 = vld [vmem:[%s6381_s16 + $0x1e4] ss:$16 sps:$4 sm:$0xff]  }
 0x197   : > { %1363 = vmatpush1.bf16.msra.mxu0 %v4493_v59  ;;  %v5131_v59 = vld [vmem:[%s6381_s16 + $0x1a0] ss:$16 sps:$4 sm:$0xff]  }
 0x198   : > { %1364 = vmatprep.subr.bf16.mxu0 %v4502_v62  ;;  %1404 = vmatpush1.bf16.msra.mxu1 %v4495_v5  ;;  %v5136_v62 = vld [vmem:[%s6381_s16 + $0x1ac] ss:$16 sps:$4 sm:$0xff]   ;;  %v5140_v5 = vld [vmem:[%s6381_s16 + $0x1c8] ss:$16 sps:$4 sm:$0xff]  }
 0x199   : > { %1405 = vmatprep.subr.bf16.mxu1 %v4504_v7  ;;  %v5146_v7 = vld [vmem:[%s6381_s16 + $0x1e8] ss:$16 sps:$4 sm:$0xff]  }
 0x19b   : > { %1365 = vmatpush1.bf16.msra.mxu0 %v4501_v4  ;;  %v5151_v4 = vld [vmem:[%s6381_s16 + $0x204] ss:$16 sps:$4 sm:$0xff]  }
 0x19c   : > { %2252 = vmatprep.subr.bf16.mxu0 %v5055_v3  ;;  %1406 = vmatpush1.bf16.msra.mxu1 %v4503_v12  ;;  %v5143_v3 = vld [vmem:[%s6381_s16 + $0x1e0] ss:$16 sps:$4 sm:$0xff]  }
 0x19d   : > { %2334 = vmatprep.subr.bf16.mxu1 %v5058_v11  ;;  %v908_v11 = vlaneseq }
 0x19e   : > { %1383 = vmatmul.mubr.bf16.vlgmr.msra.gmra.mrb[4].mxu0 %v6463_v10 }
 0x19f   : > { %2253 = vmatpush1.bf16.msra.mxu0 %v5053_v6  ;;  %1424 = vmatmul.mubr.bf16.vlgmr.msra.gmra.mrb[4].mxu1 %v6463_v10  ;;  %v5085_v10 = vld [vmem:[%s6381_s16 + $0xa4] ss:$16 sps:$4 sm:$0xff]   ;;  %v5148_v6 = vld [vmem:[%s6381_s16 + $0x1ec] ss:$16 sps:$4 sm:$0xff]   ;;  %v6565_v12 = vshrl.u32 %v908_v11, 7 }
 0x1a0   : > { %2254 = vmatprep.subr.bf16.mxu0 %v5061_v9  ;;  %2335 = vmatpush1.bf16.msra.mxu1 %v5056_v15  ;;  %v5154_v9 = vld [vmem:[%s6381_s16 + $0x20c] ss:$16 sps:$4 sm:$0xff]  }
 0x1a1   : > { %2336 = vmatprep.subr.bf16.mxu1 %v5064_v16  ;;  %v6574_v15 = vsub.s32 1, %v6565_v12  ;;  %v5202_v11 = vld [vmem:[%s6381_s16 + $0x30c] ss:$16 sps:$4 sm:$0xff]  }
 0x1a3   : > { %2255 = vmatpush1.bf16.msra.mxu0 %v5059_v13  ;;  %v6568_v13 = vsub.s32 0, %v6565_v12 }
 0x1a4   : > { %2256 = vmatprep.subr.bf16.mxu0 %v5067_v14  ;;  %2337 = vmatpush1.bf16.msra.mxu1 %v5062_v19  ;;  %v6571_v14 = vld [vmem:[%s6373_s6] sm:$0xff]  ;;  %v6581_v19 = vsub.s32 3, %v6565_v12 }
 0x1a5   : > { %2338 = vmatprep.subr.bf16.mxu1 %v5070_v20  ;;  %v911_v16 = vrot.slane %v6571_v14, %v6568_v13 }
 0x1a7   : > { %2257 = vmatpush1.bf16.msra.mxu0 %v5065_v17  ;;  %v915_v17 = vrot.slane %v6571_v14, %v6574_v15 }
 0x1a8   : > { %2258 = vmatprep.subr.bf16.mxu0 %v5073_v18  ;;  %2339 = vmatpush1.bf16.msra.mxu1 %v5068_v23 }
 0x1a9   : > { %2340 = vmatprep.subr.bf16.mxu1 %v5076_v24 }
 0x1ab   : > { %2259 = vmatpush1.bf16.msra.mxu0 %v5071_v21 }
 0x1ac   : > { %2260 = vmatprep.subr.bf16.mxu0 %v5079_v22  ;;  %2341 = vmatpush1.bf16.msra.mxu1 %v5074_v26  ;;  %v923_v26 = vrot.slane %v6571_v14, %v6581_v19 }
 0x1ad   : > { %2342 = vmatprep.subr.bf16.mxu1 %v5082_v27 }
 0x1af   : > { %2261 = vmatpush1.bf16.msra.mxu0 %v5077_v25 }
 0x1b0   : > { %2262 = vmatprep.subr.bf16.mxu0 %v5085_v10  ;;  %2343 = vmatpush1.bf16.msra.mxu1 %v5080_v30 }
 0x1b1   : > { %2344 = vmatprep.subr.bf16.mxu1 %v5088_v31  ;;  %v5149_v31 = vld [vmem:[%s6381_s16 + $0x200] ss:$16 sps:$4 sm:$0xff]  }
 0x1b3   : > { %2263 = vmatpush1.bf16.msra.mxu0 %v5083_v28 }
 0x1b4   : > { %2264 = vmatprep.subr.bf16.mxu0 %v5091_v29  ;;  %2345 = vmatpush1.bf16.msra.mxu1 %v5086_v34 }
 0x1b5   : > { %2346 = vmatprep.subr.bf16.mxu1 %v5094_v35  ;;  %v5157_v35 = vld [vmem:[%s6381_s16 + $0x224] ss:$16 sps:$4 sm:$0xff]  }
 0x1b7   : > { %2265 = vmatpush1.bf16.msra.mxu0 %v5089_v32  ;;  %v5152_v32 = vld [vmem:[%s6381_s16 + $0x208] ss:$16 sps:$4 sm:$0xff]  }
 0x1b8   : > { %2266 = vmatprep.subr.bf16.mxu0 %v5097_v33  ;;  %2347 = vmatpush1.bf16.msra.mxu1 %v5092_v38 }
 0x1b9   : > { %2348 = vmatprep.subr.bf16.mxu1 %v5100_v39 }
 0x1bb   : > { %2267 = vmatpush1.bf16.msra.mxu0 %v5095_v36  ;;  %v5160_v36 = vld [vmem:[%s6381_s16 + $0x22c] ss:$16 sps:$4 sm:$0xff]  }
 0x1bc   : > { %2268 = vmatprep.subr.bf16.mxu0 %v5103_v37  ;;  %2349 = vmatpush1.bf16.msra.mxu1 %v5098_v42  ;;  %v5158_v42 = vld [vmem:[%s6381_s16 + $0x228] ss:$16 sps:$4 sm:$0xff]  }
 0x1bd   : > { %2350 = vmatprep.subr.bf16.mxu1 %v5106_v43  ;;  %v5163_v43 = vld [vmem:[%s6381_s16 + $0x244] ss:$16 sps:$4 sm:$0xff]  }
 0x1bf   : > { %2269 = vmatpush1.bf16.msra.mxu0 %v5101_v40 }
 0x1c0   : > { %2270 = vmatprep.subr.bf16.mxu0 %v5109_v41  ;;  %2351 = vmatpush1.bf16.msra.mxu1 %v5104_v45  ;;  %v5155_v41 = vld [vmem:[%s6381_s16 + $0x220] ss:$16 sps:$4 sm:$0xff]  }
 0x1c1   : > { %2352 = vmatprep.subr.bf16.mxu1 %v5112_v46  ;;  %v5161_v46 = vld [vmem:[%s6381_s16 + $0x240] ss:$16 sps:$4 sm:$0xff]  }
 0x1c3   : > { %2271 = vmatpush1.bf16.msra.mxu0 %v5107_v8  ;;  %v5166_v8 = vld [vmem:[%s6381_s16 + $0x24c] ss:$16 sps:$4 sm:$0xff]  }
 0x1c4   : > { %2272 = vmatprep.subr.bf16.mxu0 %v5115_v44  ;;  %2353 = vmatpush1.bf16.msra.mxu1 %v5110_v49  ;;  %v5172_v49 = vld [vmem:[%s6381_s16 + $0x26c] ss:$16 sps:$4 sm:$0xff]  }
 0x1c5   : > { %2354 = vmatprep.subr.bf16.mxu1 %v5118_v50  ;;  %v5167_v50 = vld [vmem:[%s6381_s16 + $0x260] ss:$16 sps:$4 sm:$0xff]  }
 0x1c7   : > { %2273 = vmatpush1.bf16.msra.mxu0 %v5113_v47  ;;  %v5164_v47 = vld [vmem:[%s6381_s16 + $0x248] ss:$16 sps:$4 sm:$0xff]  }
 0x1c8   : > { %2274 = vmatprep.subr.bf16.mxu0 %v5121_v48  ;;  %2355 = vmatpush1.bf16.msra.mxu1 %v5116_v53  ;;  %v5169_v48 = vld [vmem:[%s6381_s16 + $0x264] ss:$16 sps:$4 sm:$0xff]   ;;  %v5178_v53 = vld [vmem:[%s6381_s16 + $0x28c] ss:$16 sps:$4 sm:$0xff]  }
 0x1c9   : > { %2356 = vmatprep.subr.bf16.mxu1 %v5124_v54  ;;  %v5173_v54 = vld [vmem:[%s6381_s16 + $0x280] ss:$16 sps:$4 sm:$0xff]  }
 0x1cb   : > { %2275 = vmatpush1.bf16.msra.mxu0 %v5119_v51  ;;  %v5170_v51 = vld [vmem:[%s6381_s16 + $0x268] ss:$16 sps:$4 sm:$0xff]  }
 0x1cc   : > { %2276 = vmatprep.subr.bf16.mxu0 %v5127_v52  ;;  %2357 = vmatpush1.bf16.msra.mxu1 %v5122_v57  ;;  %v5175_v52 = vld [vmem:[%s6381_s16 + $0x284] ss:$16 sps:$4 sm:$0xff]   ;;  %v5184_v57 = vld [vmem:[%s6381_s16 + $0x2ac] ss:$16 sps:$4 sm:$0xff]  }
 0x1cd   : > { %2358 = vmatprep.subr.bf16.mxu1 %v5130_v58  ;;  %v5179_v58 = vld [vmem:[%s6381_s16 + $0x2a0] ss:$16 sps:$4 sm:$0xff]  }
 0x1cf   : > { %2277 = vmatpush1.bf16.msra.mxu0 %v5125_v55  ;;  %v5176_v55 = vld [vmem:[%s6381_s16 + $0x288] ss:$16 sps:$4 sm:$0xff]  }
 0x1d0   : > { %2278 = vmatprep.subr.bf16.mxu0 %v5133_v56  ;;  %2359 = vmatpush1.bf16.msra.mxu1 %v5128_v60  ;;  %v5181_v56 = vld [vmem:[%s6381_s16 + $0x2a4] ss:$16 sps:$4 sm:$0xff]  }
 0x1d1   : > { %2360 = vmatprep.subr.bf16.mxu1 %v5136_v62  ;;  %v5187_v60 = vld [vmem:[%s6381_s16 + $0x2c4] ss:$16 sps:$4 sm:$0xff]   ;;  %v5185_v62 = vld [vmem:[%s6381_s16 + $0x2c0] ss:$16 sps:$4 sm:$0xff]  }
 0x1d3   : > { %2279 = vmatpush1.bf16.msra.mxu0 %v5131_v59  ;;  %v5182_v59 = vld [vmem:[%s6381_s16 + $0x2a8] ss:$16 sps:$4 sm:$0xff]  }
 0x1d4   : > { %2280 = vmatprep.subr.bf16.mxu0 %v5139_v61  ;;  %2361 = vmatpush1.bf16.msra.mxu1 %v5134_v0  ;;  %v5190_v61 = vld [vmem:[%s6381_s16 + $0x2cc] ss:$16 sps:$4 sm:$0xff]   ;;  %v5193_v0 = vld [vmem:[%s6381_s16 + $0x2e4] ss:$16 sps:$4 sm:$0xff]  }
 0x1d5   : > { %2362 = vmatprep.subr.bf16.mxu1 %v5142_v2 }
 0x1d7   : > { %2281 = vmatpush1.bf16.msra.mxu0 %v5137_v63  ;;  %v5188_v63 = vld [vmem:[%s6381_s16 + $0x2c8] ss:$16 sps:$4 sm:$0xff]  }
 0x1d8   : > { %2282 = vmatprep.subr.bf16.mxu0 %v5145_v1  ;;  %2363 = vmatpush1.bf16.msra.mxu1 %v5140_v5  ;;  %v5196_v1 = vld [vmem:[%s6381_s16 + $0x2ec] ss:$16 sps:$4 sm:$0xff]   ;;  %v5191_v5 = vld [vmem:[%s6381_s16 + $0x2e0] ss:$16 sps:$4 sm:$0xff]  }
 0x1d9   : > { %2364 = vmatprep.subr.bf16.mxu1 %v5148_v6  ;;  %v5194_v6 = vld [vmem:[%s6381_s16 + $0x2e8] ss:$16 sps:$4 sm:$0xff]  }
 0x1db   : > { %2283 = vmatpush1.bf16.msra.mxu0 %v5143_v3 }
 0x1dc   : > { %2293 = vmatprep.subr.bf16.mxu0 %v5151_v4  ;;  %2365 = vmatpush1.bf16.msra.mxu1 %v5146_v7 }
 0x1dd   : > { %2375 = vmatprep.subr.bf16.mxu1 %v5154_v9  ;;  %v5199_v9 = vld [vmem:[%s6381_s16 + $0x304] ss:$16 sps:$4 sm:$0xff]  }
 0x251   : > { %v1302_v18 = vpop.f32.mrb[0].mxu0  ;;  %v6585_v29 = vpop.f32.mrb[0].mxu1 }
 0x252   : > { %v1303_v20 = vadd.f32 %v1302_v18, %v911_v16  ;;  %v1304_v21 = vpop.f32.mrb[1].mxu0  ;;  %v1345_v33 = vpop.f32.mrb[1].mxu1  ;;  %v5200_v18 = vld [vmem:[%s6381_s16 + $0x308] ss:$16 sps:$4 sm:$0xff]  }
 0x253   : > { %v1305_v22 = vadd.f32 %v1304_v21, %v915_v17  ;;  %v1306_v23 = vpop.f32.mrb[2].mxu0  ;;  %v1346_v37 = vadd.f32 %v1345_v33, %v923_v26  ;;  %v1347_v38 = vpop.f32.mrb[2].mxu1  ;;  %v5197_v17 = vld [vmem:[%s6381_s16 + $0x300] ss:$16 sps:$4 sm:$0xff]   ;;  %v5205_v21 = vld [vmem:[%s6381_s16 + $0x324] ss:$16 sps:$4 sm:$0xff]  }
 0x254   : > { %vm1432_vm1 = vcmp.ge.f32.partialorder %v1303_v20, 0.0  ;;  %v1440_v24 = vmul.f32 0.01, %v1303_v20  ;;  %v1307_v25 = vpop.f32.mrb[3].mxu0  ;;  %v1348_v39 = vpop.f32.mrb[3].mxu1 }
 0x255   : > { %vm1433_vm2 = vcmp.ge.f32.partialorder %v1305_v22, 0.0  ;;  %v1441_v10 = vmul.f32 0.01, %v1305_v22  ;;  %vm1435_vm3 = vcmp.ge.f32.partialorder %v1346_v37, 0.0  ;;  %v1443_v40 = vmul.f32 0.01, %v1346_v37 }
 0x256   : > { %v1448_v27 = vsel %vm1432_vm1, %v1303_v20, %v1440_v24  ;;  %v5203_v25 = vld [vmem:[%s6381_s16 + $0x320] ss:$16 sps:$4 sm:$0xff]   ;;  %v5211_v26 = vld [vmem:[%s6381_s16 + $0x344] ss:$16 sps:$4 sm:$0xff]   ;;  %v5224_v39 = vld [vmem:[%s6381_s16 + $0x388] ss:$16 sps:$4 sm:$0xff]  }
 0x257   : > { %v1449_v28 = vsel %vm1433_vm2, %v1305_v22, %v1441_v10  ;;  %v1458_v34 = vpack.c.bf16 %v1448_v27, %v1448_v27  ;;  %v1451_v44 = vsel %vm1435_vm3, %v1346_v37, %v1443_v40  ;;  %v5208_v22 = vld [vmem:[%s6381_s16 + $0x32c] ss:$16 sps:$4 sm:$0xff]   ;;  %v5206_v10 = vld [vmem:[%s6381_s16 + $0x328] ss:$16 sps:$4 sm:$0xff]   ;;  %v5215_v33 = vld [vmem:[%s6381_s16 + $0x360] ss:$16 sps:$4 sm:$0xff]  }
 0x258   : > { %v1459_v30 = vpack.c.bf16 %v1449_v28, %v1449_v28  ;;  %v1461_v45 = vpack.c.bf16 %v1451_v44, %v1451_v44  ;;  %v5214_v27 = vld [vmem:[%s6381_s16 + $0x34c] ss:$16 sps:$4 sm:$0xff]   ;;  %v5209_v28 = vld [vmem:[%s6381_s16 + $0x340] ss:$16 sps:$4 sm:$0xff]   ;;  %v6644_v37 = vsub.s32 2, %v6565_v12  ;;  %vm4122_vm2 = vcmask 1024  }
 0x259   : > { %v5221_v38 = vld [vmem:[%s6381_s16 + $0x380] ss:$16 sps:$4 sm:$0xff]   ;;  %v5229_v40 = vld [vmem:[%s6381_s16 + $0x3a4] ss:$16 sps:$4 sm:$0xff]  }
 0x25a   : > { %2284 = vmatprep.mubr.bf16.mxu0 %v1459_v30  ;;  %2366 = vmatprep.mubr.bf16.mxu1 %v1459_v30  ;;  %v5212_v30 = vld [vmem:[%s6381_s16 + $0x348] ss:$16 sps:$4 sm:$0xff]   ;;  %v5235_v44 = vld [vmem:[%s6381_s16 + $0x3c4] ss:$16 sps:$4 sm:$0xff]  }
 0x25b   : > { %2285 = vmatmul.mubr.bf16.vlgmr.msra.gmra.mrb[8].mxu0 %v1458_v34  ;;  %2367 = vmatmul.mubr.bf16.vlgmr.msra.gmra.mrb[8].mxu1 %v1458_v34  ;;  %v5218_v34 = vld [vmem:[%s6381_s16 + $0x368] ss:$16 sps:$4 sm:$0xff]  }
 0x25c   : > { %2294 = vmatpush1.bf16.msra.mxu0 %v5149_v31  ;;  %2376 = vmatpush1.bf16.msra.mxu1 %v5152_v32  ;;  %v5217_v31 = vld [vmem:[%s6381_s16 + $0x364] ss:$16 sps:$4 sm:$0xff]   ;;  %v5220_v32 = vld [vmem:[%s6381_s16 + $0x36c] ss:$16 sps:$4 sm:$0xff]  }
 0x25d   : > { %2295 = vmatprep.subr.bf16.mxu0 %v5157_v35  ;;  %2377 = vmatprep.subr.bf16.mxu1 %v5160_v36  ;;  %v5223_v35 = vld [vmem:[%s6381_s16 + $0x384] ss:$16 sps:$4 sm:$0xff]   ;;  %v5226_v36 = vld [vmem:[%s6381_s16 + $0x38c] ss:$16 sps:$4 sm:$0xff]  }
 0x25e   : > { %2325 = vmatprep.mubr.bf16.mxu0 %v1461_v45  ;;  %2407 = vmatprep.mubr.bf16.mxu1 %v1461_v45  ;;  %v5238_v45 = vld [vmem:[%s6381_s16 + $0x3cc] ss:$16 sps:$4 sm:$0xff]  }
 0x260   : > { %2296 = vmatpush1.bf16.msra.mxu0 %v5155_v41  ;;  %2378 = vmatpush1.bf16.msra.mxu1 %v5158_v42  ;;  %v5232_v41 = vld [vmem:[%s6381_s16 + $0x3ac] ss:$16 sps:$4 sm:$0xff]   ;;  %v919_v42 = vrot.slane %v6571_v14, %v6644_v37 }
 0x261   : > { %2297 = vmatprep.subr.bf16.mxu0 %v5163_v43  ;;  %2379 = vmatprep.subr.bf16.mxu1 %v5166_v8  ;;  %v5227_v43 = vld [vmem:[%s6381_s16 + $0x3a0] ss:$16 sps:$4 sm:$0xff]   ;;  %v5230_v8 = vld [vmem:[%s6381_s16 + $0x3a8] ss:$16 sps:$4 sm:$0xff]  }
 0x264   : > { %2298 = vmatpush1.bf16.msra.mxu0 %v5161_v46  ;;  %2380 = vmatpush1.bf16.msra.mxu1 %v5164_v47  ;;  %v1344_v46 = vadd.f32 %v6585_v29, %v919_v42  ;;  %v5233_v47 = vld [vmem:[%s6381_s16 + $0x3c0] ss:$16 sps:$4 sm:$0xff]   ;;  %v5242_v29 = vld [vmem:[%s6381_s16 + $0x3e8] ss:$16 sps:$4 sm:$0xff]  }
 0x265   : > { %2299 = vmatprep.subr.bf16.mxu0 %v5169_v48  ;;  %2381 = vmatprep.subr.bf16.mxu1 %v5172_v49  ;;  %v5236_v48 = vld [vmem:[%s6381_s16 + $0x3c8] ss:$16 sps:$4 sm:$0xff]   ;;  %v5241_v49 = vld [vmem:[%s6381_s16 + $0x3e4] ss:$16 sps:$4 sm:$0xff]  }
 0x266   : > { %vm1434_vm4 = vcmp.ge.f32.partialorder %v1344_v46, 0.0 }
 0x268   : > { %2300 = vmatpush1.bf16.msra.mxu0 %v5167_v50  ;;  %2382 = vmatpush1.bf16.msra.mxu1 %v5170_v51  ;;  %v5244_v50 = vld [vmem:[%s6381_s16 + $0x3ec] ss:$16 sps:$4 sm:$0xff]   ;;  %v1442_v51 = vmul.f32 0.01, %v1344_v46 }
 0x269   : > { %2301 = vmatprep.subr.bf16.mxu0 %v5175_v52  ;;  %2383 = vmatprep.subr.bf16.mxu1 %v5178_v53  ;;  %v5239_v52 = vld [vmem:[%s6381_s16 + $0x3e0] ss:$16 sps:$4 sm:$0xff]   ;;  %v5245_v53 = vld [vmem:[%s6414_s2 + $0x40] sm:$0xff]  }
 0x26c   : > { %2302 = vmatpush1.bf16.msra.mxu0 %v5173_v54  ;;  %2384 = vmatpush1.bf16.msra.mxu1 %v5176_v55  ;;  %v5246_v54 = vld [vmem:[%s6414_s2 + $0xc0] sm:$0xff]   ;;  %v1450_v55 = vsel %vm1434_vm4, %v1344_v46, %v1442_v51 }
 0x26d   : > { %2303 = vmatprep.subr.bf16.mxu0 %v5181_v56  ;;  %2385 = vmatprep.subr.bf16.mxu1 %v5184_v57  ;;  %v5247_v56 = vld [vmem:[%s6414_s2] sm:$0xff]  }
 0x26e   : > { %v5248_v57 = vld [vmem:[%s6414_s2 + $0x80] sm:$0xff]  }
 0x270   : > { %2304 = vmatpush1.bf16.msra.mxu0 %v5179_v58  ;;  %2386 = vmatpush1.bf16.msra.mxu1 %v5182_v59  ;;  %v1460_v58 = vpack.c.bf16 %v1450_v55, %v1450_v55  ;;  %v5249_v59 = vld [vmem:[%s6414_s2 + $0x48] sm:$0xff]  }
 0x271   : > { %2305 = vmatprep.subr.bf16.mxu0 %v5187_v60  ;;  %2387 = vmatprep.subr.bf16.mxu1 %v5190_v61  ;;  %v6615_v2 = vpop.f32.mrb[4].mxu0  ;;  %v5250_v60 = vld [vmem:[%s6414_s2 + $0xc8] sm:$0xff]  }
 0x272   : > { %v6617_v3 = vpop.f32.mrb[5].mxu0  ;;  %v6623_v16 = vpop.f32.mrb[4].mxu1  ;;  %v5251_v61 = vld [vmem:[%s6414_s2 + $0x8] sm:$0xff]  }
 0x273   : > { %v1388_v4 = vpop.f32.mrb[6].mxu0  ;;  %v6627_v20 = vpop.f32.mrb[5].mxu1 }
 0x274   : > { %2306 = vmatpush1.bf16.msra.mxu0 %v5185_v62  ;;  %2388 = vmatpush1.bf16.msra.mxu1 %v5188_v63  ;;  %v1389_v7 = vpop.f32.mrb[7].mxu0  ;;  %v1429_v23 = vpop.f32.mrb[6].mxu1  ;;  %v5252_v62 = vld [vmem:[%s6414_s2 + $0x88] sm:$0xff]   ;;  %v5253_v63 = vld [vmem:[%s6414_s2 + $0x50] sm:$0xff]  }
 0x275   : > { %2307 = vmatprep.subr.bf16.mxu0 %v5193_v0  ;;  %2389 = vmatprep.subr.bf16.mxu1 %v5196_v1  ;;  %v1430_v24 = vpop.f32.mrb[7].mxu1  ;;  %v5254_v0 = vld [vmem:[%s6414_s2 + $0xd0] sm:$0xff]   ;;  %v5259_v7 = vld [vmem:[%s6414_s2 + $0x18] sm:$0xff]   ;;  %v5266_v23 = vld [vmem:[%s6414_s2 + $0xe8] sm:$0xff]  }
 0x276   : > { %v5255_v1 = vld [vmem:[%s6414_s2 + $0x10] sm:$0xff]   ;;  %v5267_v24 = vld [vmem:[%s6414_s2 + $0x28] sm:$0xff]  }
 0x277   : > { %v5256_v4 = vld [vmem:[%s6414_s2 + $0x90] sm:$0xff]  }
 0x278   : > { %2308 = vmatpush1.bf16.msra.mxu0 %v5191_v5  ;;  %2390 = vmatpush1.bf16.msra.mxu1 %v5194_v6  ;;  %v5257_v5 = vld [vmem:[%s6414_s2 + $0x58] sm:$0xff]  }
 0x279   : > { %2309 = vmatprep.subr.bf16.mxu0 %v5199_v9  ;;  %2391 = vmatprep.subr.bf16.mxu1 %v5202_v11  ;;  %v5258_v6 = vld [vmem:[%s6414_s2 + $0xd8] sm:$0xff]   ;;  %v5261_v11 = vld [vmem:[%s6414_s2 + $0x60] sm:$0xff]  }
 0x27a   : > { %v5260_v9 = vld [vmem:[%s6414_s2 + $0x98] sm:$0xff]  }
 0x27c   : > { %2310 = vmatpush1.bf16.msra.mxu0 %v5197_v17  ;;  %2392 = vmatpush1.bf16.msra.mxu1 %v5200_v18  ;;  %v5262_v17 = vld [vmem:[%s6414_s2 + $0xe0] sm:$0xff]  }
 0x27d   : > { %2311 = vmatprep.subr.bf16.mxu0 %v5205_v21  ;;  %2393 = vmatprep.subr.bf16.mxu1 %v5208_v22  ;;  %v5263_v18 = vld [vmem:[%s6414_s2 + $0x20] sm:$0xff]   ;;  %v5265_v22 = vld [vmem:[%s6414_s2 + $0x68] sm:$0xff]  }
 0x27e   : > { %v5264_v21 = vld [vmem:[%s6414_s2 + $0xa0] sm:$0xff]  }
 0x280   : > { %2312 = vmatpush1.bf16.msra.mxu0 %v5203_v25  ;;  %2394 = vmatpush1.bf16.msra.mxu1 %v5206_v10  ;;  %v5268_v25 = vld [vmem:[%s6414_s2 + $0xa8] sm:$0xff]   ;;  %v5269_v10 = vld [vmem:[%s6414_s2 + $0x70] sm:$0xff]  }
 0x281   : > { %2313 = vmatprep.subr.bf16.mxu0 %v5211_v26  ;;  %2395 = vmatprep.subr.bf16.mxu1 %v5214_v27  ;;  %v5270_v26 = vld [vmem:[%s6414_s2 + $0xf0] sm:$0xff]  }
 0x282   : > { %v5271_v27 = vld [vmem:[%s6414_s2 + $0x30] sm:$0xff]  }
 0x284   : > { %2314 = vmatpush1.bf16.msra.mxu0 %v5209_v28  ;;  %2396 = vmatpush1.bf16.msra.mxu1 %v5212_v30  ;;  %v5272_v28 = vld [vmem:[%s6414_s2 + $0xb0] sm:$0xff]   ;;  %v5273_v30 = vld [vmem:[%s6414_s2 + $0x78] sm:$0xff]  }
 0x285   : > { %2315 = vmatprep.subr.bf16.mxu0 %v5217_v31  ;;  %2397 = vmatprep.subr.bf16.mxu1 %v5220_v32  ;;  %v5274_v31 = vld [vmem:[%s6414_s2 + $0xf8] sm:$0xff]  }
 0x286   : > { %v5275_v32 = vld [vmem:[%s6414_s2 + $0x38] sm:$0xff]  }
 0x288   : > { %2316 = vmatpush1.bf16.msra.mxu0 %v5215_v33  ;;  %2398 = vmatpush1.bf16.msra.mxu1 %v5218_v34  ;;  %v5276_v33 = vld [vmem:[%s6414_s2 + $0xb8] sm:$0xff]  }
 0x289   : > { %2317 = vmatprep.subr.bf16.mxu0 %v5223_v35  ;;  %2399 = vmatprep.subr.bf16.mxu1 %v5226_v36  ;;  %v5279_v34 = vld [vmem:[%s6390_s20 + $0x4] ss:$16 sps:$4 sm:$0xff]   ;;  %v5282_v35 = vld [vmem:[%s6390_s20 + $0xc] ss:$16 sps:$4 sm:$0xff]   ;;  %v930_v36 = vsub.s32 5, %v6565_v12 }
 0x28c   : > { %2318 = vmatpush1.bf16.msra.mxu0 %v5221_v38  ;;  %2400 = vmatpush1.bf16.msra.mxu1 %v5224_v39  ;;  %v931_v38 = vrot.slane %v6571_v14, %v930_v36  ;;  %v1590_v39 = vld [vmem:[%s6383_s21] sm:$0xf]  ;;  %v5307_v36 = vld [vmem:[%s6390_s20 + $0xa0] ss:$16 sps:$4 sm:$0xff]  }
 0x28d   : > { %2319 = vmatprep.subr.bf16.mxu0 %v5229_v40  ;;  %2401 = vmatprep.subr.bf16.mxu1 %v5232_v41  ;;  %v1595_v40 = vrot.slane %v1590_v39, %v6568_v13  ;;  %v1603_v41 = vrot.slane %v1590_v39, %v6644_v37 }
 0x28e   : > { %v1387_v42 = vadd.f32 %v6617_v3, %v931_v38  ;;  %v5310_v38 = vld [vmem:[%s6390_s20 + $0xa8] ss:$16 sps:$4 sm:$0xff]  }
 0x290   : > { %2320 = vmatpush1.bf16.msra.mxu0 %v5227_v43  ;;  %2402 = vmatpush1.bf16.msra.mxu1 %v5230_v8  ;;  %v1599_v43 = vrot.slane %v1590_v39, %v6574_v15  ;;  %v1607_v8 = vrot.slane %v1590_v39, %v6581_v19  ;;  %vm1437_vm5 = vcmp.ge.f32.partialorder %v1387_v42, 0.0  ;;  %v5315_v39 = vld [vmem:[%s6390_s20 + $0xc4] ss:$16 sps:$4 sm:$0xff]  }
 0x291   : > { %2321 = vmatprep.subr.bf16.mxu0 %v5235_v44  ;;  %2403 = vmatprep.subr.bf16.mxu1 %v5238_v45 }
 0x294   : > { %2322 = vmatpush1.bf16.msra.mxu0 %v5233_v47  ;;  %2404 = vmatpush1.bf16.msra.mxu1 %v5236_v48 }
 0x295   : > { %2323 = vmatprep.subr.bf16.mxu0 %v5241_v49  ;;  %2405 = vmatprep.subr.bf16.mxu1 %v5244_v50  ;;  %v1445_v50 = vmul.f32 0.01, %v1387_v42 }
 0x298   : > { %2324 = vmatpush1.bf16.msra.mxu0 %v5239_v52  ;;  %2406 = vmatpush1.bf16.msra.mxu1 %v5242_v29 }
 0x299   : > { %4840 = vmatprep.subr.bf16.mxu0 %v5245_v53  ;;  %4862 = vmatprep.subr.bf16.mxu1 %v5246_v54 }
 0x29b   : > { %2326 = vmatmul.mubr.bf16.vlgmr.msra.gmra.mrb[8].mxu0 %v1460_v58  ;;  %2408 = vmatmul.mubr.bf16.vlgmr.msra.gmra.mrb[8].mxu1 %v1460_v58 }
 0x29c   : > { %4841 = vmatpush3.bf16.msra.mxu0 %v5247_v56  ;;  %4863 = vmatpush3.bf16.msra.mxu1 %v5248_v57 }
 0x29d   : > { %4842 = vmatprep.subr.bf16.mxu0 %v5249_v59  ;;  %4864 = vmatprep.subr.bf16.mxu1 %v5250_v60 }
 0x2a0   : > { %4843 = vmatpush3.bf16.msra.mxu0 %v5251_v61  ;;  %4865 = vmatpush3.bf16.msra.mxu1 %v5252_v62 }
 0x2a1   : > { %4844 = vmatprep.subr.bf16.mxu0 %v5253_v63  ;;  %4866 = vmatprep.subr.bf16.mxu1 %v5254_v0 }
 0x2a4   : > { %4845 = vmatpush3.bf16.msra.mxu0 %v5255_v1  ;;  %4867 = vmatpush3.bf16.msra.mxu1 %v5256_v4  ;;  %v5277_v1 = vld [vmem:[%s6390_s20] ss:$16 sps:$4 sm:$0xff]   ;;  %v5280_v4 = vld [vmem:[%s6390_s20 + $0x8] ss:$16 sps:$4 sm:$0xff]  }
 0x2a5   : > { %4846 = vmatprep.subr.bf16.mxu0 %v5257_v5  ;;  %4868 = vmatprep.subr.bf16.mxu1 %v5258_v6  ;;  %v1453_v5 = vsel %vm1437_vm5, %v1387_v42, %v1445_v50  ;;  %v5316_v42 = vld [vmem:[%s6390_s20 + $0xc8] ss:$16 sps:$4 sm:$0xff]   ;;  %v5333_v50 = vld [vmem:[%s6390_s20 + $0x124] ss:$16 sps:$4 sm:$0xff]  }
 0x2a8   : > { %4847 = vmatpush3.bf16.msra.mxu0 %v5259_v7  ;;  %4869 = vmatpush3.bf16.msra.mxu1 %v5260_v9  ;;  %v5285_v9 = vld [vmem:[%s6390_s20 + $0x24] ss:$16 sps:$4 sm:$0xff]  }
 0x2a9   : > { %4848 = vmatprep.subr.bf16.mxu0 %v5261_v11  ;;  %4870 = vmatprep.subr.bf16.mxu1 %v5262_v17  ;;  %v5288_v11 = vld [vmem:[%s6390_s20 + $0x2c] ss:$16 sps:$4 sm:$0xff]   ;;  %v2784_v17 = vpack.c.bf16 %v1453_v5, %v1453_v5 }
 0x2aa   : > { %v5360_v5 = vld [vmem:[%s6390_s20 + $0x1ac] ss:$16 sps:$4 sm:$0xff]  }
 0x2ac   : > { %4849 = vmatpush3.bf16.msra.mxu0 %v5263_v18  ;;  %4871 = vmatpush3.bf16.msra.mxu1 %v5264_v21  ;;  %v5283_v18 = vld [vmem:[%s6390_s20 + $0x20] ss:$16 sps:$4 sm:$0xff]   ;;  %v5286_v21 = vld [vmem:[%s6390_s20 + $0x28] ss:$16 sps:$4 sm:$0xff]  }
 0x2ad   : > { %4850 = vmatprep.subr.bf16.mxu0 %v5265_v22  ;;  %4872 = vmatprep.subr.bf16.mxu1 %v5266_v23  ;;  %v5291_v22 = vld [vmem:[%s6390_s20 + $0x44] ss:$16 sps:$4 sm:$0xff]   ;;  %v5294_v23 = vld [vmem:[%s6390_s20 + $0x4c] ss:$16 sps:$4 sm:$0xff]  }
 0x2b0   : > { %4851 = vmatpush3.bf16.msra.mxu0 %v5267_v24  ;;  %4873 = vmatpush3.bf16.msra.mxu1 %v5268_v25  ;;  %v5289_v24 = vld [vmem:[%s6390_s20 + $0x40] ss:$16 sps:$4 sm:$0xff]   ;;  %v5292_v25 = vld [vmem:[%s6390_s20 + $0x48] ss:$16 sps:$4 sm:$0xff]  }
 0x2b1   : > { %4852 = vmatprep.subr.bf16.mxu0 %v5269_v10  ;;  %4874 = vmatprep.subr.bf16.mxu1 %v5270_v26  ;;  %v5297_v10 = vld [vmem:[%s6390_s20 + $0x64] ss:$16 sps:$4 sm:$0xff]   ;;  %v5300_v26 = vld [vmem:[%s6390_s20 + $0x6c] ss:$16 sps:$4 sm:$0xff]  }
 0x2b4   : > { %4853 = vmatpush3.bf16.msra.mxu0 %v5271_v27  ;;  %4875 = vmatpush3.bf16.msra.mxu1 %v5272_v28  ;;  %v5295_v27 = vld [vmem:[%s6390_s20 + $0x60] ss:$16 sps:$4 sm:$0xff]   ;;  %v5298_v28 = vld [vmem:[%s6390_s20 + $0x68] ss:$16 sps:$4 sm:$0xff]  }
 0x2b5   : > { %4854 = vmatprep.subr.bf16.mxu0 %v5273_v30  ;;  %4876 = vmatprep.subr.bf16.mxu1 %v5274_v31  ;;  %v5303_v30 = vld [vmem:[%s6390_s20 + $0x84] ss:$16 sps:$4 sm:$0xff]   ;;  %v5306_v31 = vld [vmem:[%s6390_s20 + $0x8c] ss:$16 sps:$4 sm:$0xff]  }
 0x2b8   : > { %4855 = vmatpush3.bf16.msra.mxu0 %v5275_v32  ;;  %4877 = vmatpush3.bf16.msra.mxu1 %v5276_v33  ;;  %v5301_v32 = vld [vmem:[%s6390_s20 + $0x80] ss:$16 sps:$4 sm:$0xff]   ;;  %v5304_v33 = vld [vmem:[%s6390_s20 + $0x88] ss:$16 sps:$4 sm:$0xff]  }
 0x2b9   : > { %3577 = vmatprep.subr.bf16.mxu0 %v5279_v34  ;;  %3659 = vmatprep.subr.bf16.mxu1 %v5282_v35  ;;  %v5309_v34 = vld [vmem:[%s6390_s20 + $0xa4] ss:$16 sps:$4 sm:$0xff]   ;;  %v5312_v35 = vld [vmem:[%s6390_s20 + $0xac] ss:$16 sps:$4 sm:$0xff]  }
 0x36e   : > { %v2327_v44 = vpop.f32.mrb[8].mxu0  ;;  %v2409_v45 = vpop.f32.mrb[8].mxu1 }
 0x36f   : > { %v4928_v46 = vadd.f32 %v2327_v44, %v1595_v40  ;;  %v4930_v47 = vadd.f32 %v2409_v45, %v1603_v41  ;;  %v2329_v48 = vpop.f32.mrb[9].mxu0  ;;  %v2411_v49 = vpop.f32.mrb[9].mxu1  ;;  %v5318_v40 = vld [vmem:[%s6390_s20 + $0xcc] ss:$16 sps:$4 sm:$0xff]   ;;  %v5313_v41 = vld [vmem:[%s6390_s20 + $0xc0] ss:$16 sps:$4 sm:$0xff]  }
 0x370   : > { %v4929_v51 = vadd.f32 %v2329_v48, %v1599_v43  ;;  %v4931_v52 = vadd.f32 %v2411_v49, %v1607_v8  ;;  %v2331_v29 = vpop.f32.mrb[10].mxu0  ;;  %v2413_v53 = vpop.f32.mrb[10].mxu1  ;;  %v5321_v43 = vld [vmem:[%s6390_s20 + $0xe4] ss:$16 sps:$4 sm:$0xff]   ;;  %v5324_v8 = vld [vmem:[%s6390_s20 + $0xec] ss:$16 sps:$4 sm:$0xff]  }
 0x371   : > { %vm2416_vm6 = vcmp.ge.f32.partialorder %v4928_v46, 0.0  ;;  %v2420_v54 = vmul.f32 0.01, %v4928_v46  ;;  %vm2418_vm7 = vcmp.ge.f32.partialorder %v4930_v47, 0.0  ;;  %v2422_v3 = vmul.f32 0.01, %v4930_v47 }
 0x372   : > { %vm2417_vm8 = vcmp.ge.f32.partialorder %v4929_v51, 0.0  ;;  %v2421_v55 = vmul.f32 0.01, %v4929_v51  ;;  %vm2419_vm9 = vcmp.ge.f32.partialorder %v4931_v52, 0.0  ;;  %v2423_v56 = vmul.f32 0.01, %v4931_v52 }
 0x373   : > { %v2424_v57 = vsel %vm2416_vm6, %v4928_v46, %v2420_v54  ;;  %v2426_v58 = vsel %vm2418_vm7, %v4930_v47, %v2422_v3  ;;  %v2332_v59 = vpop.f32.mrb[11].mxu0  ;;  %v2414_v60 = vpop.f32.mrb[11].mxu1  ;;  %v5319_v44 = vld [vmem:[%s6390_s20 + $0xe0] ss:$16 sps:$4 sm:$0xff]   ;;  %v5322_v45 = vld [vmem:[%s6390_s20 + $0xe8] ss:$16 sps:$4 sm:$0xff]  }
 0x374   : > { %v2425_v61 = vsel %vm2417_vm8, %v4929_v51, %v2421_v55  ;;  %v2427_v62 = vsel %vm2419_vm9, %v4931_v52, %v2423_v56  ;;  %v2428_v6 = vpack.c.bf16 %v2424_v57, %v2424_v57  ;;  %v2430_v7 = vpack.c.bf16 %v2426_v58, %v2426_v58  ;;  %v5327_v46 = vld [vmem:[%s6390_s20 + $0x104] ss:$16 sps:$4 sm:$0xff]   ;;  %v5330_v47 = vld [vmem:[%s6390_s20 + $0x10c] ss:$16 sps:$4 sm:$0xff]   ;;  %v5325_v48 = vld [vmem:[%s6390_s20 + $0x100] ss:$16 sps:$4 sm:$0xff]  }
 0x375   : > { %v2429_v63 = vpack.c.bf16 %v2425_v61, %v2425_v61  ;;  %v2431_v0 = vpack.c.bf16 %v2427_v62, %v2427_v62  ;;  %v5328_v49 = vld [vmem:[%s6390_s20 + $0x108] ss:$16 sps:$4 sm:$0xff]   ;;  %v5336_v51 = vld [vmem:[%s6390_s20 + $0x12c] ss:$16 sps:$4 sm:$0xff]   ;;  %v5331_v52 = vld [vmem:[%s6390_s20 + $0x120] ss:$16 sps:$4 sm:$0xff]  }
 0x376   : > { %v5334_v29 = vld [vmem:[%s6390_s20 + $0x128] ss:$16 sps:$4 sm:$0xff]   ;;  %v5339_v53 = vld [vmem:[%s6390_s20 + $0x144] ss:$16 sps:$4 sm:$0xff]   ;;  %v5342_v54 = vld [vmem:[%s6390_s20 + $0x14c] ss:$16 sps:$4 sm:$0xff]  }
 0x377   : > { %2727 = vmatprep.mubr.bf16.mxu0 %v2429_v63  ;;  %2767 = vmatprep.mubr.bf16.mxu1 %v2431_v0  ;;  %v5337_v3 = vld [vmem:[%s6390_s20 + $0x140] ss:$16 sps:$4 sm:$0xff]   ;;  %v5340_v55 = vld [vmem:[%s6390_s20 + $0x148] ss:$16 sps:$4 sm:$0xff]   ;;  %v5345_v56 = vld [vmem:[%s6390_s20 + $0x164] ss:$16 sps:$4 sm:$0xff]  }
 0x378   : > { %2728 = vmatmul.mubr.bf16.vlgmr.msra.gmra.mrb[12].mxu0 %v2428_v6  ;;  %2768 = vmatmul.mubr.bf16.vlgmr.msra.gmra.mrb[12].mxu1 %v2430_v7  ;;  %v5348_v57 = vld [vmem:[%s6390_s20 + $0x16c] ss:$16 sps:$4 sm:$0xff]   ;;  %v5343_v58 = vld [vmem:[%s6390_s20 + $0x160] ss:$16 sps:$4 sm:$0xff]   ;;  %v5346_v59 = vld [vmem:[%s6390_s20 + $0x168] ss:$16 sps:$4 sm:$0xff]  }
 0x379   : > { %3578 = vmatpush1.bf16.msra.mxu0 %v5277_v1  ;;  %3660 = vmatpush1.bf16.msra.mxu1 %v5280_v4  ;;  %v5351_v60 = vld [vmem:[%s6390_s20 + $0x184] ss:$16 sps:$4 sm:$0xff]   ;;  %v5354_v61 = vld [vmem:[%s6390_s20 + $0x18c] ss:$16 sps:$4 sm:$0xff]   ;;  %v926_v62 = vsub.s32 4, %v6565_v12  ;;  %v938_v63 = vsub.s32 7, %v6565_v12 }
 0x37a   : > { %3609 = vmatprep.mubr.bf16.mxu0 %v2784_v17  ;;  %3691 = vmatprep.mubr.bf16.mxu1 %v2784_v17  ;;  %v5349_v0 = vld [vmem:[%s6390_s20 + $0x180] ss:$16 sps:$4 sm:$0xff]   ;;  %v5352_v1 = vld [vmem:[%s6390_s20 + $0x188] ss:$16 sps:$4 sm:$0xff]   ;;  %v5357_v4 = vld [vmem:[%s6390_s20 + $0x1a4] ss:$16 sps:$4 sm:$0xff]  }
 0x37b   : > { %3579 = vmatprep.subr.bf16.mxu0 %v5285_v9  ;;  %3661 = vmatprep.subr.bf16.mxu1 %v5288_v11  ;;  %v927_v6 = vrot.slane %v6571_v14, %v926_v62  ;;  %v939_v7 = vrot.slane %v6571_v14, %v938_v63  ;;  %v5355_v9 = vld [vmem:[%s6390_s20 + $0x1a0] ss:$16 sps:$4 sm:$0xff]   ;;  %v5358_v11 = vld [vmem:[%s6390_s20 + $0x1a8] ss:$16 sps:$4 sm:$0xff]   ;;  %v5363_v17 = vld [vmem:[%s6390_s20 + $0x1c4] ss:$16 sps:$4 sm:$0xff]  }
 0x37c   : > { %v5364_v14 = vld [vmem:[%s6390_s20 + $0x1c8] ss:$16 sps:$4 sm:$0xff]   ;;  %v5423_v62 = vld [vmem:[%s6390_s20 + $0x304] ss:$16 sps:$4 sm:$0xff]   ;;  %v5426_v63 = vld [vmem:[%s6390_s20 + $0x30c] ss:$16 sps:$4 sm:$0xff]  }
 0x37d   : > { %3580 = vmatpush1.bf16.msra.mxu0 %v5283_v18  ;;  %3662 = vmatpush1.bf16.msra.mxu1 %v5286_v21  ;;  %v5366_v18 = vld [vmem:[%s6390_s20 + $0x1cc] ss:$16 sps:$4 sm:$0xff]   ;;  %v1385_v21 = vadd.f32 %v6615_v2, %v927_v6  ;;  %v5367_v2 = vld [vmem:[%s6390_s20 + $0x1e0] ss:$16 sps:$4 sm:$0xff]  }
 0x37e   : > { %3581 = vmatprep.subr.bf16.mxu0 %v5291_v22  ;;  %3663 = vmatprep.subr.bf16.mxu1 %v5294_v23  ;;  %v1428_v22 = vadd.f32 %v6627_v20, %v939_v7  ;;  %v5361_v23 = vld [vmem:[%s6390_s20 + $0x1c0] ss:$16 sps:$4 sm:$0xff]   ;;  %v5370_v20 = vld [vmem:[%s6390_s20 + $0x1e8] ss:$16 sps:$4 sm:$0xff]  }
 0x37f   : > { %vm1436_vm10 = vcmp.ge.f32.partialorder %v1385_v21, 0.0  ;;  %v5427_v6 = vld [vmem:[%s6390_s20 + $0x320] ss:$16 sps:$4 sm:$0xff]   ;;  %v5430_v7 = vld [vmem:[%s6390_s20 + $0x328] ss:$16 sps:$4 sm:$0xff]  }
 0x380   : > { %vm1439_vm11 = vcmp.ge.f32.partialorder %v1428_v22, 0.0 }
 0x381   : > { %3582 = vmatpush1.bf16.msra.mxu0 %v5289_v24  ;;  %3664 = vmatpush1.bf16.msra.mxu1 %v5292_v25  ;;  %v5369_v24 = vld [vmem:[%s6390_s20 + $0x1e4] ss:$16 sps:$4 sm:$0xff]   ;;  %v5372_v25 = vld [vmem:[%s6390_s20 + $0x1ec] ss:$16 sps:$4 sm:$0xff]  }
 0x382   : > { %3583 = vmatprep.subr.bf16.mxu0 %v5297_v10  ;;  %3665 = vmatprep.subr.bf16.mxu1 %v5300_v26  ;;  %v1444_v10 = vmul.f32 0.01, %v1385_v21  ;;  %v1447_v26 = vmul.f32 0.01, %v1428_v22 }
 0x385   : > { %3584 = vmatpush1.bf16.msra.mxu0 %v5295_v27  ;;  %3666 = vmatpush1.bf16.msra.mxu1 %v5298_v28  ;;  %v5375_v27 = vld [vmem:[%s6390_s20 + $0x204] ss:$16 sps:$4 sm:$0xff]   ;;  %v5378_v28 = vld [vmem:[%s6390_s20 + $0x20c] ss:$16 sps:$4 sm:$0xff]  }
 0x386   : > { %3585 = vmatprep.subr.bf16.mxu0 %v5303_v30  ;;  %3667 = vmatprep.subr.bf16.mxu1 %v5306_v31  ;;  %v1452_v30 = vsel %vm1436_vm10, %v1385_v21, %v1444_v10  ;;  %v1455_v31 = vsel %vm1439_vm11, %v1428_v22, %v1447_v26  ;;  %v5441_v21 = vld [vmem:[%s6390_s20 + $0x364] ss:$16 sps:$4 sm:$0xff]   ;;  %v5444_v22 = vld [vmem:[%s6390_s20 + $0x36c] ss:$16 sps:$4 sm:$0xff]   ;;  %v5445_v26 = vld [vmem:[%s6390_s20 + $0x380] ss:$16 sps:$4 sm:$0xff]  }
 0x387   : > { %v5450_v10 = vld [vmem:[%s6390_s20 + $0x38c] ss:$16 sps:$4 sm:$0xff]  }
 0x389   : > { %3586 = vmatpush1.bf16.msra.mxu0 %v5301_v32  ;;  %3668 = vmatpush1.bf16.msra.mxu1 %v5304_v33  ;;  %v5373_v32 = vld [vmem:[%s6390_s20 + $0x200] ss:$16 sps:$4 sm:$0xff]   ;;  %v2783_v33 = vpack.c.bf16 %v1452_v30, %v1452_v30  ;;  %v5456_v30 = vld [vmem:[%s6390_s20 + $0x3ac] ss:$16 sps:$4 sm:$0xff]  }
 0x38a   : > { %3587 = vmatprep.subr.bf16.mxu0 %v5309_v34  ;;  %3669 = vmatprep.subr.bf16.mxu1 %v5312_v35  ;;  %v5376_v34 = vld [vmem:[%s6390_s20 + $0x208] ss:$16 sps:$4 sm:$0xff]   ;;  %v2786_v35 = vpack.c.bf16 %v1455_v31, %v1455_v31 }
 0x38b   : > { %v5454_v31 = vld [vmem:[%s6390_s20 + $0x3a8] ss:$16 sps:$4 sm:$0xff]  }
 0x38d   : > { %3588 = vmatpush1.bf16.msra.mxu0 %v5307_v36  ;;  %3670 = vmatpush1.bf16.msra.mxu1 %v5310_v38  ;;  %v5381_v36 = vld [vmem:[%s6390_s20 + $0x224] ss:$16 sps:$4 sm:$0xff]   ;;  %v5384_v38 = vld [vmem:[%s6390_s20 + $0x22c] ss:$16 sps:$4 sm:$0xff]  }
 0x38e   : > { %3589 = vmatprep.subr.bf16.mxu0 %v5315_v39  ;;  %3671 = vmatprep.subr.bf16.mxu1 %v5318_v40  ;;  %v5379_v39 = vld [vmem:[%s6390_s20 + $0x220] ss:$16 sps:$4 sm:$0xff]   ;;  %v5382_v40 = vld [vmem:[%s6390_s20 + $0x228] ss:$16 sps:$4 sm:$0xff]  }
 0x391   : > { %3590 = vmatpush1.bf16.msra.mxu0 %v5313_v41  ;;  %3672 = vmatpush1.bf16.msra.mxu1 %v5316_v42  ;;  %v5387_v41 = vld [vmem:[%s6390_s20 + $0x244] ss:$16 sps:$4 sm:$0xff]   ;;  %v5390_v42 = vld [vmem:[%s6390_s20 + $0x24c] ss:$16 sps:$4 sm:$0xff]  }
 0x392   : > { %3591 = vmatprep.subr.bf16.mxu0 %v5321_v43  ;;  %3673 = vmatprep.subr.bf16.mxu1 %v5324_v8  ;;  %v5385_v43 = vld [vmem:[%s6390_s20 + $0x240] ss:$16 sps:$4 sm:$0xff]   ;;  %v5388_v8 = vld [vmem:[%s6390_s20 + $0x248] ss:$16 sps:$4 sm:$0xff]  }
 0x395   : > { %3592 = vmatpush1.bf16.msra.mxu0 %v5319_v44  ;;  %3674 = vmatpush1.bf16.msra.mxu1 %v5322_v45  ;;  %v5393_v44 = vld [vmem:[%s6390_s20 + $0x264] ss:$16 sps:$4 sm:$0xff]   ;;  %v5396_v45 = vld [vmem:[%s6390_s20 + $0x26c] ss:$16 sps:$4 sm:$0xff]  }
 0x396   : > { %3593 = vmatprep.subr.bf16.mxu0 %v5327_v46  ;;  %3675 = vmatprep.subr.bf16.mxu1 %v5330_v47  ;;  %v5391_v46 = vld [vmem:[%s6390_s20 + $0x260] ss:$16 sps:$4 sm:$0xff]   ;;  %v5394_v47 = vld [vmem:[%s6390_s20 + $0x268] ss:$16 sps:$4 sm:$0xff]  }
 0x399   : > { %3594 = vmatpush1.bf16.msra.mxu0 %v5325_v48  ;;  %3676 = vmatpush1.bf16.msra.mxu1 %v5328_v49  ;;  %v5399_v48 = vld [vmem:[%s6390_s20 + $0x284] ss:$16 sps:$4 sm:$0xff]   ;;  %v5402_v49 = vld [vmem:[%s6390_s20 + $0x28c] ss:$16 sps:$4 sm:$0xff]  }
 0x39a   : > { %3595 = vmatprep.subr.bf16.mxu0 %v5333_v50  ;;  %3677 = vmatprep.subr.bf16.mxu1 %v5336_v51  ;;  %v5397_v50 = vld [vmem:[%s6390_s20 + $0x280] ss:$16 sps:$4 sm:$0xff]   ;;  %v5400_v51 = vld [vmem:[%s6390_s20 + $0x288] ss:$16 sps:$4 sm:$0xff]  }
 0x39d   : > { %3596 = vmatpush1.bf16.msra.mxu0 %v5331_v52  ;;  %3678 = vmatpush1.bf16.msra.mxu1 %v5334_v29  ;;  %v5405_v52 = vld [vmem:[%s6390_s20 + $0x2a4] ss:$16 sps:$4 sm:$0xff]   ;;  %v5408_v29 = vld [vmem:[%s6390_s20 + $0x2ac] ss:$16 sps:$4 sm:$0xff]  }
 0x39e   : > { %3597 = vmatprep.subr.bf16.mxu0 %v5339_v53  ;;  %3679 = vmatprep.subr.bf16.mxu1 %v5342_v54  ;;  %v5403_v53 = vld [vmem:[%s6390_s20 + $0x2a0] ss:$16 sps:$4 sm:$0xff]   ;;  %v5406_v54 = vld [vmem:[%s6390_s20 + $0x2a8] ss:$16 sps:$4 sm:$0xff]  }
 0x3a1   : > { %3598 = vmatpush1.bf16.msra.mxu0 %v5337_v3  ;;  %3680 = vmatpush1.bf16.msra.mxu1 %v5340_v55  ;;  %v5411_v3 = vld [vmem:[%s6390_s20 + $0x2c4] ss:$16 sps:$4 sm:$0xff]   ;;  %v5414_v55 = vld [vmem:[%s6390_s20 + $0x2cc] ss:$16 sps:$4 sm:$0xff]  }
 0x3a2   : > { %3599 = vmatprep.subr.bf16.mxu0 %v5345_v56  ;;  %3681 = vmatprep.subr.bf16.mxu1 %v5348_v57  ;;  %v5409_v56 = vld [vmem:[%s6390_s20 + $0x2c0] ss:$16 sps:$4 sm:$0xff]   ;;  %v5412_v57 = vld [vmem:[%s6390_s20 + $0x2c8] ss:$16 sps:$4 sm:$0xff]  }
 0x3a5   : > { %3600 = vmatpush1.bf16.msra.mxu0 %v5343_v58  ;;  %3682 = vmatpush1.bf16.msra.mxu1 %v5346_v59  ;;  %v5417_v58 = vld [vmem:[%s6390_s20 + $0x2e4] ss:$16 sps:$4 sm:$0xff]   ;;  %v5420_v59 = vld [vmem:[%s6390_s20 + $0x2ec] ss:$16 sps:$4 sm:$0xff]  }
 0x3a6   : > { %3601 = vmatprep.subr.bf16.mxu0 %v5351_v60  ;;  %3683 = vmatprep.subr.bf16.mxu1 %v5354_v61  ;;  %v5415_v60 = vld [vmem:[%s6390_s20 + $0x2e0] ss:$16 sps:$4 sm:$0xff]   ;;  %v5418_v61 = vld [vmem:[%s6390_s20 + $0x2e8] ss:$16 sps:$4 sm:$0xff]  }
 0x3a9   : > { %3602 = vmatpush1.bf16.msra.mxu0 %v5349_v0  ;;  %3684 = vmatpush1.bf16.msra.mxu1 %v5352_v1  ;;  %v5421_v0 = vld [vmem:[%s6390_s20 + $0x300] ss:$16 sps:$4 sm:$0xff]   ;;  %v5424_v1 = vld [vmem:[%s6390_s20 + $0x308] ss:$16 sps:$4 sm:$0xff]  }
 0x3aa   : > { %3603 = vmatprep.subr.bf16.mxu0 %v5357_v4  ;;  %3685 = vmatprep.subr.bf16.mxu1 %v5360_v5  ;;  %v5429_v4 = vld [vmem:[%s6390_s20 + $0x324] ss:$16 sps:$4 sm:$0xff]   ;;  %v5432_v5 = vld [vmem:[%s6390_s20 + $0x32c] ss:$16 sps:$4 sm:$0xff]  }
 0x3ad   : > { %3604 = vmatpush1.bf16.msra.mxu0 %v5355_v9  ;;  %3686 = vmatpush1.bf16.msra.mxu1 %v5358_v11  ;;  %v5435_v9 = vld [vmem:[%s6390_s20 + $0x344] ss:$16 sps:$4 sm:$0xff]   ;;  %v5438_v11 = vld [vmem:[%s6390_s20 + $0x34c] ss:$16 sps:$4 sm:$0xff]  }
 0x3ae   : > { %3605 = vmatprep.subr.bf16.mxu0 %v5363_v17  ;;  %3687 = vmatprep.subr.bf16.mxu1 %v5366_v18  ;;  %v5433_v17 = vld [vmem:[%s6390_s20 + $0x340] ss:$16 sps:$4 sm:$0xff]   ;;  %v5436_v18 = vld [vmem:[%s6390_s20 + $0x348] ss:$16 sps:$4 sm:$0xff]  }
 0x3b1   : > { %3606 = vmatpush1.bf16.msra.mxu0 %v5361_v23  ;;  %3688 = vmatpush1.bf16.msra.mxu1 %v5364_v14  ;;  %v5439_v23 = vld [vmem:[%s6390_s20 + $0x360] ss:$16 sps:$4 sm:$0xff]   ;;  %v5442_v14 = vld [vmem:[%s6390_s20 + $0x368] ss:$16 sps:$4 sm:$0xff]  }
 0x3b2   : > { %3607 = vmatprep.subr.bf16.mxu0 %v5369_v24  ;;  %3689 = vmatprep.subr.bf16.mxu1 %v5372_v25  ;;  %v5447_v24 = vld [vmem:[%s6390_s20 + $0x384] ss:$16 sps:$4 sm:$0xff]   ;;  %v934_v25 = vsub.s32 6, %v6565_v12  ;;  %v5451_v12 = vld [vmem:[%s6390_s20 + $0x3a0] ss:$16 sps:$4 sm:$0xff]  }
 0x3b5   : > { %3608 = vmatpush1.bf16.msra.mxu0 %v5367_v2  ;;  %3690 = vmatpush1.bf16.msra.mxu1 %v5370_v20  ;;  %v5448_v2 = vld [vmem:[%s6390_s20 + $0x388] ss:$16 sps:$4 sm:$0xff]   ;;  %v5453_v20 = vld [vmem:[%s6390_s20 + $0x3a4] ss:$16 sps:$4 sm:$0xff]  }
 0x3b6   : > { %3618 = vmatprep.subr.bf16.mxu0 %v5375_v27  ;;  %3700 = vmatprep.subr.bf16.mxu1 %v5378_v28  ;;  %v5505_v27 = vld [vmem:[%s6373_s6] sm:$0xff]  ;;  %s7029_s6 = sld [smem:[#allocation42_spill]] (!%p4827_p10) }
 0x3b7   : > { %v935_v28 = vrot.slane %v5505_v27, %v934_v25  ;;  %v5496_v25 = vld [vmem:[%s6419_s11 + $0xb0] sm:$0xff]   ;;  %v5499_v27 = vld [vmem:[%s6419_s11 + $0x38] sm:$0xff]  }
 0x3b8   : > { %3610 = vmatmul.mubr.bf16.vlgmr.msra.gmra.mrb[16].mxu0 %v2783_v33  ;;  %3692 = vmatmul.mubr.bf16.vlgmr.msra.gmra.mrb[16].mxu1 %v2783_v33 }
 0x3b9   : > { %3619 = vmatpush1.bf16.msra.mxu0 %v5373_v32  ;;  %3650 = vmatprep.mubr.bf16.mxu0 %v2786_v35  ;;  %v5459_v32 = vld [vmem:[%s6390_s20 + $0x3c4] ss:$16 sps:$4 sm:$0xff]   ;;  %v1426_v33 = vadd.f32 %v6623_v16, %v935_v28  ;;  %v5463_v16 = vld [vmem:[%s6390_s20 + $0x3e0] ss:$16 sps:$4 sm:$0xff]  }
 0x3ba   : > { %3701 = vmatpush1.bf16.msra.mxu1 %v5376_v34  ;;  %3732 = vmatprep.mubr.bf16.mxu1 %v2786_v35  ;;  %v5462_v34 = vld [vmem:[%s6390_s20 + $0x3cc] ss:$16 sps:$4 sm:$0xff]   ;;  %v5457_v35 = vld [vmem:[%s6390_s20 + $0x3c0] ss:$16 sps:$4 sm:$0xff]   ;;  %v5500_v28 = vld [vmem:[%s6419_s11 + $0xb8] sm:$0xff]  }
 0x3bb   : > { %3620 = vmatprep.subr.bf16.mxu0 %v5381_v36  ;;  %3702 = vmatprep.subr.bf16.mxu1 %v5384_v38  ;;  %v5460_v36 = vld [vmem:[%s6390_s20 + $0x3c8] ss:$16 sps:$4 sm:$0xff]   ;;  %v5465_v38 = vld [vmem:[%s6390_s20 + $0x3e4] ss:$16 sps:$4 sm:$0xff]   ;;  %vm1438_vm12 = vcmp.ge.f32.partialorder %v1426_v33, 0.0 }
 0x3bd   : > { %3621 = vmatpush1.bf16.msra.mxu0 %v5379_v39  ;;  %v1446_v39 = vmul.f32 0.01, %v1426_v33 }
 0x3be   : > { %3703 = vmatpush1.bf16.msra.mxu1 %v5382_v40  ;;  %3622 = vmatprep.subr.bf16.mxu0 %v5387_v41  ;;  %v5468_v40 = vld [vmem:[%s6390_s20 + $0x3ec] ss:$16 sps:$4 sm:$0xff]   ;;  %v5466_v41 = vld [vmem:[%s6390_s20 + $0x3e8] ss:$16 sps:$4 sm:$0xff]  }
 0x3bf   : > { %3704 = vmatprep.subr.bf16.mxu1 %v5390_v42  ;;  %v5469_v42 = vld [vmem:[%s6419_s11 + $0x40] sm:$0xff]  }
 0x3c1   : > { %3623 = vmatpush1.bf16.msra.mxu0 %v5385_v43  ;;  %v1454_v43 = vsel %vm1438_vm12, %v1426_v33, %v1446_v39 }
 0x3c2   : > { %3705 = vmatpush1.bf16.msra.mxu1 %v5388_v8  ;;  %3624 = vmatprep.subr.bf16.mxu0 %v5393_v44  ;;  %v5470_v8 = vld [vmem:[%s6419_s11 + $0xc0] sm:$0xff]  }
 0x3c3   : > { %3706 = vmatprep.subr.bf16.mxu1 %v5396_v45  ;;  %v5471_v44 = vld [vmem:[%s6419_s11] sm:$0xff]   ;;  %v2785_v45 = vpack.c.bf16 %v1454_v43, %v1454_v43 }
 0x3c5   : > { %3625 = vmatpush1.bf16.msra.mxu0 %v5391_v46  ;;  %v5472_v46 = vld [vmem:[%s6419_s11 + $0x80] sm:$0xff]  }
 0x3c6   : > { %3707 = vmatpush1.bf16.msra.mxu1 %v5394_v47  ;;  %3626 = vmatprep.subr.bf16.mxu0 %v5399_v48  ;;  %v5473_v47 = vld [vmem:[%s6419_s11 + $0x48] sm:$0xff]  }
 0x3c7   : > { %3708 = vmatprep.subr.bf16.mxu1 %v5402_v49  ;;  %v5474_v48 = vld [vmem:[%s6419_s11 + $0xc8] sm:$0xff]  }
 0x3c8   : > { %v5475_v49 = vld [vmem:[%s6419_s11 + $0x8] sm:$0xff]  }
 0x3c9   : > { %3627 = vmatpush1.bf16.msra.mxu0 %v5397_v50  ;;  %v5476_v50 = vld [vmem:[%s6419_s11 + $0x88] sm:$0xff]  }
 0x3ca   : > { %3709 = vmatpush1.bf16.msra.mxu1 %v5400_v51  ;;  %3628 = vmatprep.subr.bf16.mxu0 %v5405_v52  ;;  %v5477_v51 = vld [vmem:[%s6419_s11 + $0x50] sm:$0xff]  }
 0x3cb   : > { %3710 = vmatprep.subr.bf16.mxu1 %v5408_v29  ;;  %v5478_v52 = vld [vmem:[%s6419_s11 + $0xd0] sm:$0xff]  }
 0x3cc   : > { %v5479_v29 = vld [vmem:[%s6419_s11 + $0x10] sm:$0xff]  }
 0x3cd   : > { %3629 = vmatpush1.bf16.msra.mxu0 %v5403_v53  ;;  %v5480_v53 = vld [vmem:[%s6419_s11 + $0x90] sm:$0xff]  }
 0x3ce   : > { %3711 = vmatpush1.bf16.msra.mxu1 %v5406_v54  ;;  %3630 = vmatprep.subr.bf16.mxu0 %v5411_v3  ;;  %v5481_v54 = vld [vmem:[%s6419_s11 + $0x58] sm:$0xff]  }
 0x3cf   : > { %3712 = vmatprep.subr.bf16.mxu1 %v5414_v55  ;;  %v5482_v3 = vld [vmem:[%s6419_s11 + $0xd8] sm:$0xff]  }
 0x3d0   : > { %v5483_v55 = vld [vmem:[%s6419_s11 + $0x18] sm:$0xff]  }
 0x3d1   : > { %3631 = vmatpush1.bf16.msra.mxu0 %v5409_v56  ;;  %v5484_v56 = vld [vmem:[%s6419_s11 + $0x98] sm:$0xff]  }
 0x3d2   : > { %3713 = vmatpush1.bf16.msra.mxu1 %v5412_v57  ;;  %3632 = vmatprep.subr.bf16.mxu0 %v5417_v58  ;;  %v5485_v57 = vld [vmem:[%s6419_s11 + $0x60] sm:$0xff]  }
 0x3d3   : > { %3714 = vmatprep.subr.bf16.mxu1 %v5420_v59  ;;  %v5486_v58 = vld [vmem:[%s6419_s11 + $0xe0] sm:$0xff]  }
 0x3d4   : > { %v5487_v59 = vld [vmem:[%s6419_s11 + $0x20] sm:$0xff]  }
 0x3d5   : > { %3633 = vmatpush1.bf16.msra.mxu0 %v5415_v60  ;;  %v5488_v60 = vld [vmem:[%s6419_s11 + $0xa0] sm:$0xff]  }
 0x3d6   : > { %3715 = vmatpush1.bf16.msra.mxu1 %v5418_v61  ;;  %3634 = vmatprep.subr.bf16.mxu0 %v5423_v62  ;;  %v5489_v61 = vld [vmem:[%s6419_s11 + $0x68] sm:$0xff]  }
 0x3d7   : > { %3716 = vmatprep.subr.bf16.mxu1 %v5426_v63  ;;  %v5490_v62 = vld [vmem:[%s6419_s11 + $0xe8] sm:$0xff]  }
 0x3d8   : > { %v5491_v63 = vld [vmem:[%s6419_s11 + $0x28] sm:$0xff]  }
 0x3d9   : > { %3635 = vmatpush1.bf16.msra.mxu0 %v5421_v0  ;;  %v5492_v0 = vld [vmem:[%s6419_s11 + $0xa8] sm:$0xff]  }
 0x3da   : > { %3717 = vmatpush1.bf16.msra.mxu1 %v5424_v1  ;;  %3636 = vmatprep.subr.bf16.mxu0 %v5429_v4 }
 0x3db   : > { %3718 = vmatprep.subr.bf16.mxu1 %v5432_v5  ;;  %v4633_v5 = vld [vmem:[%s691_s7] ss:$0 sm:$0xff] }
 0x3dd   : > { %3637 = vmatpush1.bf16.msra.mxu0 %v5427_v6 }
 0x3de   : > { %3719 = vmatpush1.bf16.msra.mxu1 %v5430_v7  ;;  %3638 = vmatprep.subr.bf16.mxu0 %v5435_v9  ;;  %v5493_v9 = vld [vmem:[%s6419_s11 + $0x70] sm:$0xff]  }
 0x3df   : > { %3720 = vmatprep.subr.bf16.mxu1 %v5438_v11  ;;  %v5494_v11 = vld [vmem:[%s6419_s11 + $0xf0] sm:$0xff]  }
 0x3e1   : > { %3639 = vmatpush1.bf16.msra.mxu0 %v5433_v17 }
 0x3e2   : > { %3721 = vmatpush1.bf16.msra.mxu1 %v5436_v18  ;;  %3640 = vmatprep.subr.bf16.mxu0 %v5441_v21 }
 0x3e3   : > { %3722 = vmatprep.subr.bf16.mxu1 %v5444_v22 }
 0x3e5   : > { %3641 = vmatpush1.bf16.msra.mxu0 %v5439_v23 }
 0x3e6   : > { %3723 = vmatpush1.bf16.msra.mxu1 %v5442_v14  ;;  %3642 = vmatprep.subr.bf16.mxu0 %v5447_v24  ;;  %v5495_v24 = vld [vmem:[%s6419_s11 + $0x30] sm:$0xff]  }
 0x3e7   : > { %3724 = vmatprep.subr.bf16.mxu1 %v5450_v10 }
 0x3e9   : > { %3643 = vmatpush1.bf16.msra.mxu0 %v5445_v26 }
 0x3ea   : > { %3725 = vmatpush1.bf16.msra.mxu1 %v5448_v2  ;;  %3644 = vmatprep.subr.bf16.mxu0 %v5453_v20  ;;  %v5497_v2 = vld [vmem:[%s6419_s11 + $0x78] sm:$0xff]  }
 0x3eb   : > { %3726 = vmatprep.subr.bf16.mxu1 %v5456_v30  ;;  %v5498_v20 = vld [vmem:[%s6419_s11 + $0xf8] sm:$0xff]   ;;  %v6877_v30 = vld [vmem:[%s656_s9] sm:$0x1] }
 0x3ed   : > { %3645 = vmatpush1.bf16.msra.mxu0 %v5451_v12  ;;  %v1457_v12 = vsub.f32 1.0, %v6877_v30 }
 0x3ee   : > { %3727 = vmatpush1.bf16.msra.mxu1 %v5454_v31  ;;  %3646 = vmatprep.subr.bf16.mxu0 %v5459_v32 }
 0x3ef   : > { %3728 = vmatprep.subr.bf16.mxu1 %v5462_v34  ;;  %v6881_v31 = vrot.slane %v1457_v12, %v6568_v13 }
 0x3f1   : > { %3647 = vmatpush1.bf16.msra.mxu0 %v5457_v35  ;;  %v2915_v35 = vld [vmem:[%s6396_s26] sm:$0xf] }
 0x3f2   : > { %3729 = vmatpush1.bf16.msra.mxu1 %v5460_v36  ;;  %3648 = vmatprep.subr.bf16.mxu0 %v5465_v38  ;;  %v2920_v36 = vrot.slane %v2915_v35, %v6568_v13  ;;  %v2928_v38 = vrot.slane %v2915_v35, %v6644_v37  ;;  %v2924_v39 = vrot.slane %v2915_v35, %v6574_v15 }
 0x3f3   : > { %3730 = vmatprep.subr.bf16.mxu1 %v5468_v40  ;;  %v2932_v40 = vrot.slane %v2915_v35, %v6581_v19 }
 0x3f5   : > { %3649 = vmatpush1.bf16.msra.mxu0 %v5463_v16 }
 0x3f6   : > { %3731 = vmatpush1.bf16.msra.mxu1 %v5466_v41  ;;  %4884 = vmatprep.subr.bf16.mxu0 %v5469_v42 }
 0x3f7   : > { %4906 = vmatprep.subr.bf16.mxu1 %v5470_v8 }
 0x3f8   : > { %3651 = vmatmul.mubr.bf16.vlgmr.msra.gmra.mrb[16].mxu0 %v2785_v45 }
 0x3f9   : > { %3733 = vmatmul.mubr.bf16.vlgmr.msra.gmra.mrb[16].mxu1 %v2785_v45  ;;  %4885 = vmatpush3.bf16.msra.mxu0 %v5471_v44 }
 0x3fa   : > { %4907 = vmatpush3.bf16.msra.mxu1 %v5472_v46  ;;  %4886 = vmatprep.subr.bf16.mxu0 %v5473_v47 }
 0x3fb   : > { %4908 = vmatprep.subr.bf16.mxu1 %v5474_v48 }
 0x3fd   : > { %4887 = vmatpush3.bf16.msra.mxu0 %v5475_v49 }
 0x3fe   : > { %4909 = vmatpush3.bf16.msra.mxu1 %v5476_v50  ;;  %4888 = vmatprep.subr.bf16.mxu0 %v5477_v51 }
 0x3ff   : > { %4910 = vmatprep.subr.bf16.mxu1 %v5478_v52 }
 0x401   : > { %4889 = vmatpush3.bf16.msra.mxu0 %v5479_v29 }
 0x402   : > { %4911 = vmatpush3.bf16.msra.mxu1 %v5480_v53  ;;  %4890 = vmatprep.subr.bf16.mxu0 %v5481_v54 }
 0x403   : > { %4912 = vmatprep.subr.bf16.mxu1 %v5482_v3 }
 0x405   : > { %4891 = vmatpush3.bf16.msra.mxu0 %v5483_v55 }
 0x406   : > { %4913 = vmatpush3.bf16.msra.mxu1 %v5484_v56  ;;  %4892 = vmatprep.subr.bf16.mxu0 %v5485_v57 }
 0x407   : > { %4914 = vmatprep.subr.bf16.mxu1 %v5486_v58  ;;  %v4117_v58 = vld [vmem:[#allocation3] sm:$0x3] }
 0x409   : > { %4893 = vmatpush3.bf16.msra.mxu0 %v5487_v59 }
 0x40a   : > { %4915 = vmatpush3.bf16.msra.mxu1 %v5488_v60  ;;  %4894 = vmatprep.subr.bf16.mxu0 %v5489_v61 }
 0x40b   : > { %4916 = vmatprep.subr.bf16.mxu1 %v5490_v62 }
 0x40d   : > { %4895 = vmatpush3.bf16.msra.mxu0 %v5491_v63 }
 0x40e   : > { %4917 = vmatpush3.bf16.msra.mxu1 %v5492_v0  ;;  %4896 = vmatprep.subr.bf16.mxu0 %v5493_v9 }
 0x40f   : > { %4918 = vmatprep.subr.bf16.mxu1 %v5494_v11 }
 0x411   : > { %4897 = vmatpush3.bf16.msra.mxu0 %v5495_v24  ;;  %v5506_v24 = vld [vmem:[#allocation2] sm:$0x3] }
 0x412   : > { %4919 = vmatpush3.bf16.msra.mxu1 %v5496_v25  ;;  %4898 = vmatprep.subr.bf16.mxu0 %v5497_v2 }
 0x413   : > { %4920 = vmatprep.subr.bf16.mxu1 %v5498_v20 }
 0x415   : > { %4899 = vmatpush3.bf16.msra.mxu0 %v5499_v27 }
 0x416   : > { %4921 = vmatpush3.bf16.msra.mxu1 %v5500_v28 }
 0x44b   : > { %v4856_v1 = vpop.f32.mrb[12].mxu0  ;;  %v4878_v4 = vpop.f32.mrb[12].mxu1 }
 0x44c   : > { %v4857_v6 = vpop.f32.mrb[13].mxu0  ;;  %v4879_v7 = vpop.f32.mrb[13].mxu1 }
 0x44d   : > { %v4858_v17 = vadd.f32 %v4857_v6, %v4856_v1  ;;  %v4880_v18 = vadd.f32 %v4879_v7, %v4878_v4  ;;  %v4859_v21 = vpop.f32.mrb[14].mxu0  ;;  %v4881_v22 = vpop.f32.mrb[14].mxu1  ;;  %v4794_v1 = vld [vmem:[%s7028_s18] ss:$0 sm:$0xff] }
 0x44e   : > { %v4860_v23 = vpop.f32.mrb[15].mxu0  ;;  %v4882_v14 = vpop.f32.mrb[15].mxu1 }
 0x44f   : > { %v2730_v10 = vadd.f32 %v4858_v17, %v4633_v5  ;;  %v4111_v23 = vrot.slane %v6877_v30, %v6568_v13 }
 0x451   : > { %v2770_v26 = vadd.f32 %v4880_v18, %v2730_v10  ;;  %v4113_v10 = vmul.f32 %v5506_v24, %v4111_v23 }
 0x453   : > { %5501 = vtanh.f32 %v2770_v26 }
 0x45d   : > { %v5502_v32 = vpop.eup %5501 }
 0x45e   : > { %v2782_v33 = vmul.f32 %v5502_v32, %v6881_v31 }
 0x460   : > { %v4118_v34 = vsel %vm4115_vm13, %v2782_v33, 0.0  ;;  %v4103_v61 = vsub.f32 0.0, %v2782_v33 }
 0x461   : > { %4119 = vadd.xlane.f32.xlu0 %v4118_v34 }
 0x462   : > { %v4104_v62 = vmul.f32 1.442695, %v4103_v61 }
 0x464   : > { %5503 = vpow2.f32 %v4104_v62 }
 0x46e   : > { %v5504_v2 = vpop.eup %5503 }
 0x4cb   : > { %v3652_v16 = vpop.f32.mrb[16].mxu0 }
 0x4cc   : > { %v4932_v41 = vadd.f32 %v3652_v16, %v2920_v36  ;;  %v3734_v42 = vpop.f32.mrb[16].mxu1  ;;  %v3654_v43 = vpop.f32.mrb[17].mxu0 }
 0x4cd   : > { %v4934_v8 = vadd.f32 %v3734_v42, %v2928_v38  ;;  %v4933_v44 = vadd.f32 %v3654_v43, %v2924_v39  ;;  %v3736_v45 = vpop.f32.mrb[17].mxu1  ;;  %v3656_v46 = vpop.f32.mrb[18].mxu0 }
 0x4ce   : > { %vm3741_vm14 = vcmp.ge.f32.partialorder %v4932_v41, 0.0  ;;  %v3745_v47 = vmul.f32 0.01, %v4932_v41  ;;  %v4935_v48 = vadd.f32 %v3736_v45, %v2932_v40  ;;  %v3738_v49 = vpop.f32.mrb[18].mxu1  ;;  %v3657_v50 = vpop.f32.mrb[19].mxu0 }
 0x4cf   : > { %vm3743_vm15 = vcmp.ge.f32.partialorder %v4934_v8, 0.0  ;;  %v3747_v51 = vmul.f32 0.01, %v4934_v8  ;;  %vm3742_vm0 = vcmp.ge.f32.partialorder %v4933_v44, 0.0  ;;  %v3746_v37 = vmul.f32 0.01, %v4933_v44 }
 0x4d0   : > { %v3749_v15 = vsel %vm3741_vm14, %v4932_v41, %v3745_v47  ;;  %vm3744_vm1 = vcmp.ge.f32.partialorder %v4935_v48, 0.0  ;;  %v3748_v19 = vmul.f32 0.01, %v4935_v48  ;;  %v3739_v52 = vpop.f32.mrb[19].mxu1 }
 0x4d1   : > { %v3751_v29 = vsel %vm3743_vm15, %v4934_v8, %v3747_v51  ;;  %v3750_v53 = vsel %vm3742_vm0, %v4933_v44, %v3746_v37  ;;  %v3753_v55 = vpack.c.bf16 %v3749_v15, %v3749_v15 }
 0x4d2   : > { %v3754_v54 = vpack.c.bf16 %v3750_v53, %v3750_v53  ;;  %v3752_v3 = vsel %vm3744_vm1, %v4935_v48, %v3748_v19  ;;  %v3755_v57 = vpack.c.bf16 %v3751_v29, %v3751_v29 }
 0x4d3   : > { %v3756_v56 = vpack.c.bf16 %v3752_v3, %v3752_v3 }
 0x4d4   : > { %4052 = vmatprep.mubr.bf16.mxu0 %v3754_v54 }
 0x4d5   : > { %4092 = vmatprep.mubr.bf16.mxu1 %v3756_v56  ;;  %4053 = vmatmul.mubr.bf16.vlgmr.msra.gmra.mrb[20].mxu0 %v3753_v55 }
 0x4d6   : > { %4093 = vmatmul.mubr.bf16.vlgmr.msra.gmra.mrb[20].mxu1 %v3755_v57 }
 0x4ee   : > { %v4120_v59 = vpop.xlane.xlu0 %4119 }
 0x4ef   : > { %v4121_v60 = vsub.f32 %v4117_v58, %v4120_v59 }
 0x4f1   : > { %4123 = vst.msk [vmem:[#allocation3] sm:$0x3] %vm4122_vm2, %v4121_v60 }
 0x4f8   : > { %v4130_v12 = vld [vmem:[#allocation3] sm:$0x3] (!%p4827_p10) }
 0x4f9   : > { %4131 = vst.msk [vmem:[%s7029_s6] sm:$0x3] (!%p4827_p10), %vm4122_vm2, %v4130_v12 }
 0x5a8   : > { %v4900_v63 = vpop.f32.mrb[20].mxu0 }
 0x5a9   : > { %v4922_v0 = vpop.f32.mrb[20].mxu1  ;;  %v4901_v4 = vpop.f32.mrb[21].mxu0 }
 0x5aa   : > { %v4902_v5 = vadd.f32 %v4901_v4, %v4900_v63  ;;  %v4923_v6 = vpop.f32.mrb[21].mxu1  ;;  %v4903_v7 = vpop.f32.mrb[22].mxu0 }
 0x5ab   : > { %v4924_v9 = vadd.f32 %v4923_v6, %v4922_v0  ;;  %v4925_v11 = vpop.f32.mrb[22].mxu1  ;;  %v4904_v17 = vpop.f32.mrb[23].mxu0 }
 0x5ac   : > { %v4055_v18 = vadd.f32 %v4902_v5, %v4794_v1  ;;  %v4926_v21 = vpop.f32.mrb[23].mxu1 }
 0x5ae   : > { %v4095_v22 = vadd.f32 %v4924_v9, %v4055_v18 }
 0x5b0   : > { %v4100_v14 = vmul.f32 %v4095_v22, %v6881_v31 }
 0x5b2   : > { %v4101_v25 = vsub.f32 %v5506_v24, %v4100_v14 }
 0x5b4   : > { %v4102_v26 = vmul.f32 %v4101_v25, %v6881_v31  ;;  %4127 = sbr.rel (%p4827_p10) target bundleno = 1475 (0x5c3), region = 120 }
 0x5b6   : > { %v4106_v20 = vmul.f32 %v5504_v2, %v4102_v26 }
 0x5b8   : > { %v4114_v27 = vadd.f32 %v4113_v10, %v4106_v20 }
 0x5ba   : > { %4116 = vst.msk [vmem:[#allocation2] sm:$0x3] %vm4115_vm13, %v4114_v27 }
 0x5c1   : > { %v4128_v28 = vld [vmem:[#allocation2] sm:$0x3] }
 0x5c2   : > { %4129 = vst [vmem:[#allocation21] sm:$0x3] %v4128_v28 }
 0x5c3 PF: > { %p5013_p11 = scmp.eq.s32.totalorder %s6177_s3, 3  ;;  %s5905_s16 = smov [#allocation21]  }
 0x5c4   : > { %s4139_s21 = sshll.u32 %s5905_s16, 4  ;;  %s4140_s21 = int_to_ptr.vmem [resolvable:$true] %s4139_s21 }
 0x5c5   : > { %s5805_s7 = scalar_lea.vmem %s4140_s21, 32  ;;  %p5812_p6 = scmp.lt.s32.totalorder %s4140_s21, %s4140_s21 }
 0x5c6   : > { %p5806_p13 = scmp.ne.s32.totalorder %s4140_s21, %s5805_s7  ;;  %p5813_p5 = scmp.lt.s32.totalorder %s5805_s7, %s5805_s7 }
 0x5c8   : > { %p5807_p8 = pnand %p5806_p13, %p5013_p11  ;;  %p5814_p7 = por %p5813_p5, %p5812_p6 }
 0x5ca   : > { %p5808_p2 = pneg %p5807_p8 }
 0x5cc   : > { %p5815_p4 = pnand %p5814_p7, %p5808_p2 }
 0x5ce   : > { %5818 = shalt.err (!%p5815_p4)
}
 0x5cf   : > { %s7030_s23 = sld [smem:[#allocation41_spill]] }
 0x5d5   : > { %s5819_s22 = scalar_lea.hbm %s7030_s23, 32 }
 0x5d6   : > { %p5820_p9 = scmp.ne.s32.totalorder %s7030_s23, %s5819_s22  ;;  %p5825_p1 = scmp.lt.u32.totalorder %s5819_s22, %s7030_s23 }
 0x5d8   : > { %p5821_p0 = pnand %p5820_p9, %p5013_p11 }
 0x5da   : > { %p5822_p12 = pneg %p5821_p0 }
 0x5dc   : > { %p5827_p3 = pnand %p5825_p1, %p5822_p12 }
 0x5de   : > { %5830 = shalt.err (!%p5827_p3)
}
 0x5df   : > { %4975 = dma.vmem_to_hbm [thread:$0]  (%p5013_p11), %s4140_s21, 32, %s7030_s23, [#allocation6]  }
 0x5e0   : > { %5872 = dma.done.wait (%p5013_p11), [#allocation6], 32  }
 0x5e1   : > { %5874 = vsyncadd (%p5013_p11), [#allocation6], 4294967264 }
 0x5e2 PF: > { %s7031_s16 = sld [smem:[#allocation30_spill]]  ;;  %s7032_s14 = sld [smem:[#allocation29_spill]] }
 0x5e3   : > { %s7033_s15 = sld [smem:[#allocation31_spill]]  ;;  %s7034_s29 = smov %s5881_s30 }
 0x5e8   : > { %p39_p10 = scmp.ge.s32.totalorder %s7031_s16, 6   ;;  %s7035_s30 = smov %s7032_s14 }
 0x5ea   :  { %41 = sbr.rel (!%p39_p10) target bundleno = 24 (0x18), region = 235 }
 0x5f1   :  { %4158 = vsyncpa [#allocation5], 1 }
 0x5f2   :  { %4160 = vsyncpa [#allocation5 + $0x1], 1 }
 0x5f3   :  { %4161 = vsyncpa [#allocation8], 1 }
 0x5f4   :  { %4163 = vsyncpa [#allocation8 + $0x1], 1 }
 0x5f5   :  { %4164 = vsyncpa [#allocation11], 1 }
 0x5f6   :  { %4166 = vsyncpa [#allocation11 + $0x1], 1 }
 0x5f7   :  { %4167 = vsyncpa [#allocation14], 1 }
 0x5f8   :  { %4169 = vsyncpa [#allocation14 + $0x1], 1 }
 0x5f9   :  { %4170 = vsyncpa [#allocation17], 1 }
 0x5fa   :  { %4172 = vsyncpa [#allocation17 + $0x1], 1 }
 0x5fb   :  { %4173 = vsyncpa [#allocation20], 1 }
 0x5fc   :  { %4175 = vsyncpa [#allocation20 + $0x1], 1 }
 0x5fd   :  { %4176 = vsyncpa [#allocation6], 1 }
 0x5fe   :  { %4178 = vsyncpa [#allocation6 + $0x1], 1 }

</bundles_post_ra>
